<compile_context>
chip_gen: v7x
topology: tpu7x:2x2x1
jax: 0.10.0
libtpu: 0.0.40
codegen_flags: <defaults>
</compile_context>

<pallas_src>
import functools

import jax
import jax.numpy as jnp
from jax import lax
from jax.experimental import pallas as pl
from jax.experimental.pallas import tpu as pltpu


# ----------------------------------------------------------------------------
# Small tiling helpers.
# ----------------------------------------------------------------------------
def _pick_tile(dim, max_tile, align=128):
    """Largest tile <= max_tile that divides `dim` (multiple of `align` if possible)."""
    if dim <= max_tile:
        return dim
    t = (max_tile // align) * align
    while t >= align:
        if dim % t == 0:
            return t
        t -= align
    return dim  # no aligned divisor: fall back to one full block


def _pick_chunk(dim, max_chunk):
    """Largest chunk <= max_chunk that divides `dim`."""
    c = min(dim, max_chunk)
    while dim % c:
        c -= 1
    return c


# ----------------------------------------------------------------------------
# Generic tiled matmul (+ optional bias) kernel.
# Used for the hoisted input projection (X @ W_ih + b) and for the decoder.
# Activations are cast to the (bf16) weight dtype; accumulation is f32.
# ----------------------------------------------------------------------------
def _matmul_bias_kernel(x_ref, w_ref, b_ref, o_ref):
    w = w_ref[...]
    acc = jnp.dot(x_ref[...].astype(w.dtype), w, preferred_element_type=jnp.float32)
    o_ref[...] = (acc + b_ref[...].astype(jnp.float32)).astype(o_ref.dtype)


def _matmul_kernel(x_ref, w_ref, o_ref):
    w = w_ref[...]
    o_ref[...] = jnp.dot(
        x_ref[...].astype(w.dtype), w, preferred_element_type=jnp.float32
    ).astype(o_ref.dtype)


def matmul_bias(x, w, bias=None, *, tile_m=256, tile_n=1024):
    """x: (M, K) f32; w: (K, N) bf16/f32; bias: (1, N) f32 or None -> (M, N) f32."""
    M, K = x.shape
    Kw, N = w.shape
    assert K == Kw
    tm = _pick_tile(M, tile_m, align=8)
    tn = _pick_tile(N, tile_n, align=128)   # lane-dense output tiles
    grid = (M // tm, N // tn)

    in_specs = [
        pl.BlockSpec((tm, K), lambda i, j: (i, 0)),
        pl.BlockSpec((K, tn), lambda i, j: (0, j)),
    ]
    args = [x, w]
    if bias is None:
        kernel = _matmul_kernel
    else:
        kernel = _matmul_bias_kernel
        in_specs.append(pl.BlockSpec((1, tn), lambda i, j: (0, j)))
        args.append(bias)

    return pl.pallas_call(
        kernel,
        out_shape=jax.ShapeDtypeStruct((M, N), jnp.float32),
        grid=grid,
        in_specs=in_specs,
        out_specs=pl.BlockSpec((tm, tn), lambda i, j: (i, j)),
        compiler_params=pltpu.CompilerParams(
            dimension_semantics=("parallel", "parallel")),
    )(*args)


# ----------------------------------------------------------------------------
# Recurrent LSTM kernel: each grid step processes `chunk` timesteps with an
# in-kernel fori_loop; only h @ W_hh is on the serial path (input gates are
# prefetched from the hoisted projection). h/c persist in VMEM scratch.
# ----------------------------------------------------------------------------
def _lstm_seq_kernel(gx_ref, whh_ref, out_ref, h_scr, c_scr, *, hidden, chunk):
    # gx_ref : (chunk, B, 4H) f32  precomputed x_t @ W_ih + b, PyTorch gate order [i,f,g,o]
    # whh_ref: (H, 4H)       bf16  recurrent weight (grid-invariant)
    # out_ref: (chunk, B, H) f32   per-step hidden states
    # h_scr/c_scr: (B, H)    f32   carry across grid iterations
    @pl.when(pl.program_id(0) == 0)
    def _():
        h_scr[...] = jnp.zeros_like(h_scr)
        c_scr[...] = jnp.zeros_like(c_scr)

    H = hidden
    whh = whh_ref[...]  # loaded once per chunk, stays resident

    def step(t, carry):
        h, c = carry
        gates = gx_ref[t] + jnp.dot(
            h.astype(whh.dtype), whh, preferred_element_type=jnp.float32)
        i_g = jax.nn.sigmoid(gates[:, 0 * H:1 * H])
        f_g = jax.nn.sigmoid(gates[:, 1 * H:2 * H])
        g_g = jnp.tanh(gates[:, 2 * H:3 * H])
        o_g = jax.nn.sigmoid(gates[:, 3 * H:4 * H])
        c_new = f_g * c + i_g * g_g
        h_new = o_g * jnp.tanh(c_new)
        out_ref[t] = h_new
        return h_new, c_new

    h, c = lax.fori_loop(0, chunk, step, (h_scr[...], c_scr[...]), unroll=True)
    h_scr[...] = h
    c_scr[...] = c


def lstm_layer(x, wih_t, whh_t, bias, *, time_chunk=16):
    """One nn.LSTM layer (eval mode).

    x: (S, B, Din) f32; wih_t: (Din, 4H) bf16; whh_t: (H, 4H) bf16; bias: (1, 4H) f32.
    """
    S, B, Din = x.shape
    H = whh_t.shape[0]

    # Hoisted input projection for ALL timesteps at once (off the serial path).
    gx = matmul_bias(x.reshape(S * B, Din), wih_t, bias)          # (S*B, 4H) f32
    gx = gx.reshape(S, B, 4 * H)

    chunk = _pick_chunk(S, time_chunk)
    kernel = functools.partial(_lstm_seq_kernel, hidden=H, chunk=chunk)
    return pl.pallas_call(
        kernel,
        out_shape=jax.ShapeDtypeStruct((S, B, H), jnp.float32),
        grid=(S // chunk,),
        in_specs=[
            pl.BlockSpec((chunk, B, 4 * H), lambda c: (c, 0, 0)),
            pl.BlockSpec((H, 4 * H), lambda c: (0, 0)),           # grid-invariant weight
        ],
        out_specs=pl.BlockSpec((chunk, B, H), lambda c: (c, 0, 0)),
        scratch_shapes=[
            pltpu.VMEM((B, H), jnp.float32),  # h carry
            pltpu.VMEM((B, H), jnp.float32),  # c carry
        ],
        compiler_params=pltpu.CompilerParams(
            dimension_semantics=("arbitrary",)),
    )(gx, whh_t)


# ----------------------------------------------------------------------------
# Parameters & full model forward.
# ----------------------------------------------------------------------------
def init_params(key, ntoken, ninp, nhid, nlayers, weight_dtype=jnp.bfloat16):
    assert ninp == nhid, "tied encoder/decoder requires ninp == nhid"
    keys = jax.random.split(key, 1 + 4 * nlayers)
    params = {}
    # Embedding: normal(0, 0.02) per init_weights(). Kept f32 for the gather output.
    emb = 0.02 * jax.random.normal(keys[0], (ntoken, ninp), jnp.float32)
    params["emb"] = emb
    stdv = 1.0 / jnp.sqrt(nhid)
    layers = []
    for l in range(nlayers):
        din = ninp if l == 0 else nhid
        k = keys[1 + 4 * l:1 + 4 * (l + 1)]
        wih = jax.random.uniform(k[0], (4 * nhid, din), jnp.float32, -stdv, stdv)
        whh = jax.random.uniform(k[1], (4 * nhid, nhid), jnp.float32, -stdv, stdv)
        bih = jax.random.uniform(k[2], (4 * nhid,), jnp.float32, -stdv, stdv)
        bhh = jax.random.uniform(k[3], (4 * nhid,), jnp.float32, -stdv, stdv)
        layers.append({
            "wih_t": wih.T.astype(weight_dtype),                  # (din, 4H)
            "whh_t": whh.T.astype(weight_dtype),                  # (H, 4H)
            "b": (bih + bhh).reshape(1, 4 * nhid),                # (1, 4H) f32
        })
    params["lstm"] = layers
    # Tied decoder: weight = embedding weight (transposed for x @ W^T); bias is zeroed
    # by init_weights(), so the bias add is dropped from the decoder kernel.
    params["dec_w_t"] = emb.T.astype(weight_dtype)                # (nhid, ntoken)
    return params


def lstm_model_forward(params, src):
    """src: (seq, batch) int32 token ids -> logits (seq, batch, ntoken) f32."""
    x = jnp.take(params["emb"], src, axis=0)                      # (S, B, ninp) gather glue
    for layer in params["lstm"]:
        x = lstm_layer(x, layer["wih_t"], layer["whh_t"], layer["b"])
    S, B, H = x.shape
    ntoken = params["dec_w_t"].shape[1]
    logits2d = matmul_bias(x.reshape(S * B, H), params["dec_w_t"], bias=None)
    return logits2d.reshape(S, B, ntoken)


if __name__ == "__main__":
    ntoken, ninp, nhid, nlayers = 256, 128, 128, 2
    seq, batch = 8, 8   # batch = 8 -> full sublane occupancy

    key = jax.random.PRNGKey(0)
    k_params, k_src = jax.random.split(key)
    params = init_params(k_params, ntoken, ninp, nhid, nlayers)
    src = jax.random.randint(k_src, (seq, batch), 0, ntoken, dtype=jnp.int32)

    logits = jax.jit(lstm_model_forward)(params, src)
    jax.block_until_ready(logits)
    assert logits.shape == (seq, batch, ntoken)
    assert logits.dtype == jnp.float32
    assert bool(jnp.all(jnp.isfinite(logits)))
    print("KERNEL_OK")
</pallas_src>

<mosaic_0001>
module attributes {stable_mosaic.version = 11 : i64} {
  func.func @_matmul_bias_kernel(%arg0: i32, %arg1: i32, %arg2: memref<64x128xf32, #tpu.memory_space<vmem>>, %arg3: memref<128x512xbf16, #tpu.memory_space<vmem>>, %arg4: memref<1x512xf32, #tpu.memory_space<vmem>>, %arg5: memref<64x512xf32, #tpu.memory_space<vmem>>) attributes {dimension_semantics = [#tpu.dimension_semantics<parallel>, #tpu.dimension_semantics<parallel>], iteration_bounds = array<i64: 1, 1>, scalar_prefetch = 0 : i64, scratch_operands = 0 : i64, tpu.core_type = #tpu.core_type<tc>, window_params = [{transform_indices = @transform_0, window_bounds = array<i64: 64, 128>}, {transform_indices = @transform_1, window_bounds = array<i64: 128, 512>}, {transform_indices = @transform_2, window_bounds = array<i64: 1, 512>}, {transform_indices = @transform_3, window_bounds = array<i64: 64, 512>}]} {
    %c0 = arith.constant 0 : index
    %c0_0 = arith.constant 0 : index
    %0 = vector.load %arg3[%c0, %c0_0] : memref<128x512xbf16, #tpu.memory_space<vmem>>, vector<128x512xbf16>
    %c0_1 = arith.constant 0 : index
    %c0_2 = arith.constant 0 : index
    %1 = vector.load %arg2[%c0_1, %c0_2] : memref<64x128xf32, #tpu.memory_space<vmem>>, vector<64x128xf32>
    %2 = arith.truncf %1 : vector<64x128xf32> to vector<64x128xbf16>
    %cst = arith.constant dense<0.000000e+00> : vector<64x512xf32>
    %3 = tpu.matmul %2, %0, %cst {dimension_numbers = #tpu.dot_dimension_numbers<[1], [0], [0], [1], [0, 0, 1, 1], [], []>} : vector<64x128xbf16>, vector<128x512xbf16>, vector<64x512xf32> -> vector<64x512xf32>
    %c0_3 = arith.constant 0 : index
    %c0_4 = arith.constant 0 : index
    %4 = vector.load %arg4[%c0_3, %c0_4] : memref<1x512xf32, #tpu.memory_space<vmem>>, vector<1x512xf32>
    %5 = vector.broadcast %4 : vector<1x512xf32> to vector<64x512xf32>
    %6 = arith.addf %3, %5 : vector<64x512xf32>
    %c0_5 = arith.constant 0 : index
    %c0_6 = arith.constant 0 : index
    %7 = vector.load %arg5[%c0_5, %c0_6] : memref<64x512xf32, #tpu.memory_space<vmem>>, vector<64x512xf32>
    tpu.vector_store %arg5[%c0_5, %c0_6], %6 {strides = array<i32>} : memref<64x512xf32, #tpu.memory_space<vmem>>, vector<64x512xf32>,
    return
  }
  func.func @transform_0(%arg0: i32, %arg1: i32) -> (i32, i32) {
    %c0_i32 = arith.constant 0 : i32
    %c0_i32_0 = arith.constant 0 : i32
    return %arg0, %c0_i32 : i32, i32
  }
  func.func @transform_1(%arg0: i32, %arg1: i32) -> (i32, i32) {
    %c0_i32 = arith.constant 0 : i32
    %c0_i32_0 = arith.constant 0 : i32
    return %c0_i32, %arg1 : i32, i32
  }
  func.func @transform_2(%arg0: i32, %arg1: i32) -> (i32, i32) {
    %c0_i32 = arith.constant 0 : i32
    %c0_i32_0 = arith.constant 0 : i32
    return %c0_i32, %arg1 : i32, i32
  }
  func.func @transform_3(%arg0: i32, %arg1: i32) -> (i32, i32) {
    %c0_i32 = arith.constant 0 : i32
    return %arg0, %arg1 : i32, i32
  }
}

module attributes {stable_mosaic.version = 11 : i64} {
  func.func @_lstm_seq_kernel(%arg0: i32, %arg1: memref<8x8x512xf32, #tpu.memory_space<vmem>>, %arg2: memref<128x512xbf16, #tpu.memory_space<vmem>>, %arg3: memref<8x8x128xf32, #tpu.memory_space<vmem>>, %arg4: memref<8x128xf32, #tpu.memory_space<vmem>>, %arg5: memref<8x128xf32, #tpu.memory_space<vmem>>) attributes {dimension_semantics = [#tpu.dimension_semantics<arbitrary>], iteration_bounds = array<i64: 1>, scalar_prefetch = 0 : i64, scratch_operands = 2 : i64, tpu.core_type = #tpu.core_type<tc>, window_params = [{transform_indices = @transform_0, window_bounds = array<i64: 8, 8, 512>}, {pipeline_mode = #tpu.pipeline_mode<synchronous>, transform_indices = @transform_1, window_bounds = array<i64: 128, 512>}, {transform_indices = @transform_2, window_bounds = array<i64: 8, 8, 128>}]} {
    %c0_i32 = arith.constant 0 : i32
    %0 = arith.cmpi eq, %arg0, %c0_i32 : i32
    %1 = arith.extui %0 : i1 to i32
    %c0_i32_0 = arith.constant 0 : i32
    %2 = arith.cmpi ne, %1, %c0_i32_0 : i32
    scf.if %2 {
      %cst_74 = arith.constant 0.000000e+00 : f32
      %288 = vector.broadcast %cst_74 : f32 to vector<8x128xf32>
      %c0_75 = arith.constant 0 : index
      %c0_76 = arith.constant 0 : index
      %289 = vector.load %arg4[%c0_75, %c0_76] : memref<8x128xf32, #tpu.memory_space<vmem>>, vector<8x128xf32>
      tpu.vector_store %arg4[%c0_75, %c0_76], %288 {strides = array<i32>} : memref<8x128xf32, #tpu.memory_space<vmem>>, vector<8x128xf32>,
      %cst_77 = arith.constant 0.000000e+00 : f32
      %290 = vector.broadcast %cst_77 : f32 to vector<8x128xf32>
      %c0_78 = arith.constant 0 : index
      %c0_79 = arith.constant 0 : index
      %291 = vector.load %arg5[%c0_78, %c0_79] : memref<8x128xf32, #tpu.memory_space<vmem>>, vector<8x128xf32>
      tpu.vector_store %arg5[%c0_78, %c0_79], %290 {strides = array<i32>} : memref<8x128xf32, #tpu.memory_space<vmem>>, vector<8x128xf32>,
    } else {
    }
    %c0 = arith.constant 0 : index
    %c0_1 = arith.constant 0 : index
    %3 = vector.load %arg2[%c0, %c0_1] : memref<128x512xbf16, #tpu.memory_space<vmem>>, vector<128x512xbf16>
    %c0_2 = arith.constant 0 : index
    %c0_3 = arith.constant 0 : index
    %4 = vector.load %arg4[%c0_2, %c0_3] : memref<8x128xf32, #tpu.memory_space<vmem>>, vector<8x128xf32>
    %c0_4 = arith.constant 0 : index
    %c0_5 = arith.constant 0 : index
    %5 = vector.load %arg5[%c0_4, %c0_5] : memref<8x128xf32, #tpu.memory_space<vmem>>, vector<8x128xf32>
    %c0_i32_6 = arith.constant 0 : i32
    %6 = arith.index_cast %c0_i32_6 : i32 to index
    %c0_7 = arith.constant 0 : index
    %c0_8 = arith.constant 0 : index
    %7 = vector.load %arg1[%6, %c0_7, %c0_8] : memref<8x8x512xf32, #tpu.memory_space<vmem>>, vector<1x8x512xf32>
    %8 = vector.shape_cast %7 : vector<1x8x512xf32> to vector<8x512xf32>
    %9 = arith.truncf %4 : vector<8x128xf32> to vector<8x128xbf16>
    %cst = arith.constant dense<0.000000e+00> : vector<8x512xf32>
    %10 = tpu.matmul %9, %3, %cst {dimension_numbers = #tpu.dot_dimension_numbers<[1], [0], [0], [1], [0, 0, 1, 1], [], []>} : vector<8x128xbf16>, vector<128x512xbf16>, vector<8x512xf32> -> vector<8x512xf32>
    %11 = arith.addf %8, %10 : vector<8x512xf32>
    %12 = vector.extract_strided_slice %11 {offsets = [0, 0], sizes = [8, 128], strides = [1, 1]} : vector<8x512xf32> to vector<8x128xf32>
    %13 = arith.negf %12 : vector<8x128xf32>
    %14 = math.exp %13 : vector<8x128xf32>
    %cst_9 = arith.constant 1.000000e+00 : f32
    %15 = vector.broadcast %cst_9 : f32 to vector<8x128xf32>
    %16 = arith.addf %15, %14 : vector<8x128xf32>
    %17 = arith.divf %15, %16 : vector<8x128xf32>
    %18 = vector.extract_strided_slice %11 {offsets = [0, 128], sizes = [8, 128], strides = [1, 1]} : vector<8x512xf32> to vector<8x128xf32>
    %19 = arith.negf %18 : vector<8x128xf32>
    %20 = math.exp %19 : vector<8x128xf32>
    %cst_10 = arith.constant 1.000000e+00 : f32
    %21 = vector.broadcast %cst_10 : f32 to vector<8x128xf32>
    %22 = arith.addf %21, %20 : vector<8x128xf32>
    %23 = arith.divf %21, %22 : vector<8x128xf32>
    %24 = vector.extract_strided_slice %11 {offsets = [0, 256], sizes = [8, 128], strides = [1, 1]} : vector<8x512xf32> to vector<8x128xf32>
    %25 = math.tanh %24 : vector<8x128xf32>
    %26 = vector.extract_strided_slice %11 {offsets = [0, 384], sizes = [8, 128], strides = [1, 1]} : vector<8x512xf32> to vector<8x128xf32>
    %27 = arith.negf %26 : vector<8x128xf32>
    %28 = math.exp %27 : vector<8x128xf32>
    %cst_11 = arith.constant 1.000000e+00 : f32
    %29 = vector.broadcast %cst_11 : f32 to vector<8x128xf32>
    %30 = arith.addf %29, %28 : vector<8x128xf32>
    %31 = arith.divf %29, %30 : vector<8x128xf32>
    %32 = arith.mulf %23, %5 : vector<8x128xf32>
    %33 = arith.mulf %17, %25 : vector<8x128xf32>
    %34 = arith.addf %32, %33 : vector<8x128xf32>
    %35 = math.tanh %34 : vector<8x128xf32>
    %36 = arith.mulf %31, %35 : vector<8x128xf32>
    %37 = arith.index_cast %c0_i32_6 : i32 to index
    %c0_12 = arith.constant 0 : index
    %c0_13 = arith.constant 0 : index
    %38 = vector.load %arg3[%37, %c0_12, %c0_13] : memref<8x8x128xf32, #tpu.memory_space<vmem>>, vector<1x8x128xf32>
    %39 = vector.shape_cast %38 : vector<1x8x128xf32> to vector<8x128xf32>
    %40 = vector.shape_cast %36 : vector<8x128xf32> to vector<1x8x128xf32>
    tpu.vector_store %arg3[%37, %c0_12, %c0_13], %40 {strides = array<i32>} : memref<8x8x128xf32, #tpu.memory_space<vmem>>, vector<1x8x128xf32>,
    %c1_i32 = arith.constant 1 : i32
    %41 = arith.index_cast %c1_i32 : i32 to index
    %c0_14 = arith.constant 0 : index
    %c0_15 = arith.constant 0 : index
    %42 = vector.load %arg1[%41, %c0_14, %c0_15] : memref<8x8x512xf32, #tpu.memory_space<vmem>>, vector<1x8x512xf32>
    %43 = vector.shape_cast %42 : vector<1x8x512xf32> to vector<8x512xf32>
    %44 = arith.truncf %36 : vector<8x128xf32> to vector<8x128xbf16>
    %cst_16 = arith.constant dense<0.000000e+00> : vector<8x512xf32>
    %45 = tpu.matmul %44, %3, %cst_16 {dimension_numbers = #tpu.dot_dimension_numbers<[1], [0], [0], [1], [0, 0, 1, 1], [], []>} : vector<8x128xbf16>, vector<128x512xbf16>, vector<8x512xf32> -> vector<8x512xf32>
    %46 = arith.addf %43, %45 : vector<8x512xf32>
    %47 = vector.extract_strided_slice %46 {offsets = [0, 0], sizes = [8, 128], strides = [1, 1]} : vector<8x512xf32> to vector<8x128xf32>
    %48 = arith.negf %47 : vector<8x128xf32>
    %49 = math.exp %48 : vector<8x128xf32>
    %cst_17 = arith.constant 1.000000e+00 : f32
    %50 = vector.broadcast %cst_17 : f32 to vector<8x128xf32>
    %51 = arith.addf %50, %49 : vector<8x128xf32>
    %52 = arith.divf %50, %51 : vector<8x128xf32>
    %53 = vector.extract_strided_slice %46 {offsets = [0, 128], sizes = [8, 128], strides = [1, 1]} : vector<8x512xf32> to vector<8x128xf32>
    %54 = arith.negf %53 : vector<8x128xf32>
    %55 = math.exp %54 : vector<8x128xf32>
    %cst_18 = arith.constant 1.000000e+00 : f32
    %56 = vector.broadcast %cst_18 : f32 to vector<8x128xf32>
    %57 = arith.addf %56, %55 : vector<8x128xf32>
    %58 = arith.divf %56, %57 : vector<8x128xf32>
    %59 = vector.extract_strided_slice %46 {offsets = [0, 256], sizes = [8, 128], strides = [1, 1]} : vector<8x512xf32> to vector<8x128xf32>
    %60 = math.tanh %59 : vector<8x128xf32>
    %61 = vector.extract_strided_slice %46 {offsets = [0, 384], sizes = [8, 128], strides = [1, 1]} : vector<8x512xf32> to vector<8x128xf32>
    %62 = arith.negf %61 : vector<8x128xf32>
    %63 = math.exp %62 : vector<8x128xf32>
    %cst_19 = arith.constant 1.000000e+00 : f32
    %64 = vector.broadcast %cst_19 : f32 to vector<8x128xf32>
    %65 = arith.addf %64, %63 : vector<8x128xf32>
    %66 = arith.divf %64, %65 : vector<8x128xf32>
    %67 = arith.mulf %58, %34 : vector<8x128xf32>
    %68 = arith.mulf %52, %60 : vector<8x128xf32>
    %69 = arith.addf %67, %68 : vector<8x128xf32>
    %70 = math.tanh %69 : vector<8x128xf32>
    %71 = arith.mulf %66, %70 : vector<8x128xf32>
    %72 = arith.index_cast %c1_i32 : i32 to index
    %c0_20 = arith.constant 0 : index
    %c0_21 = arith.constant 0 : index
    %73 = vector.load %arg3[%72, %c0_20, %c0_21] : memref<8x8x128xf32, #tpu.memory_space<vmem>>, vector<1x8x128xf32>
    %74 = vector.shape_cast %73 : vector<1x8x128xf32> to vector<8x128xf32>
    %75 = vector.shape_cast %71 : vector<8x128xf32> to vector<1x8x128xf32>
    tpu.vector_store %arg3[%72, %c0_20, %c0_21], %75 {strides = array<i32>} : memref<8x8x128xf32, #tpu.memory_space<vmem>>, vector<1x8x128xf32>,
    %c2_i32 = arith.constant 2 : i32
    %76 = arith.index_cast %c2_i32 : i32 to index
    %c0_22 = arith.constant 0 : index
    %c0_23 = arith.constant 0 : index
    %77 = vector.load %arg1[%76, %c0_22, %c0_23] : memref<8x8x512xf32, #tpu.memory_space<vmem>>, vector<1x8x512xf32>
    %78 = vector.shape_cast %77 : vector<1x8x512xf32> to vector<8x512xf32>
    %79 = arith.truncf %71 : vector<8x128xf32> to vector<8x128xbf16>
    %cst_24 = arith.constant dense<0.000000e+00> : vector<8x512xf32>
    %80 = tpu.matmul %79, %3, %cst_24 {dimension_numbers = #tpu.dot_dimension_numbers<[1], [0], [0], [1], [0, 0, 1, 1], [], []>} : vector<8x128xbf16>, vector<128x512xbf16>, vector<8x512xf32> -> vector<8x512xf32>
    %81 = arith.addf %78, %80 : vector<8x512xf32>
    %82 = vector.extract_strided_slice %81 {offsets = [0, 0], sizes = [8, 128], strides = [1, 1]} : vector<8x512xf32> to vector<8x128xf32>
    %83 = arith.negf %82 : vector<8x128xf32>
    %84 = math.exp %83 : vector<8x128xf32>
    %cst_25 = arith.constant 1.000000e+00 : f32
    %85 = vector.broadcast %cst_25 : f32 to vector<8x128xf32>
    %86 = arith.addf %85, %84 : vector<8x128xf32>
    %87 = arith.divf %85, %86 : vector<8x128xf32>
    %88 = vector.extract_strided_slice %81 {offsets = [0, 128], sizes = [8, 128], strides = [1, 1]} : vector<8x512xf32> to vector<8x128xf32>
    %89 = arith.negf %88 : vector<8x128xf32>
    %90 = math.exp %89 : vector<8x128xf32>
    %cst_26 = arith.constant 1.000000e+00 : f32
    %91 = vector.broadcast %cst_26 : f32 to vector<8x128xf32>
    %92 = arith.addf %91, %90 : vector<8x128xf32>
    %93 = arith.divf %91, %92 : vector<8x128xf32>
    %94 = vector.extract_strided_slice %81 {offsets = [0, 256], sizes = [8, 128], strides = [1, 1]} : vector<8x512xf32> to vector<8x128xf32>
    %95 = math.tanh %94 : vector<8x128xf32>
    %96 = vector.extract_strided_slice %81 {offsets = [0, 384], sizes = [8, 128], strides = [1, 1]} : vector<8x512xf32> to vector<8x128xf32>
    %97 = arith.negf %96 : vector<8x128xf32>
    %98 = math.exp %97 : vector<8x128xf32>
    %cst_27 = arith.constant 1.000000e+00 : f32
    %99 = vector.broadcast %cst_27 : f32 to vector<8x128xf32>
    %100 = arith.addf %99, %98 : vector<8x128xf32>
    %101 = arith.divf %99, %100 : vector<8x128xf32>
    %102 = arith.mulf %93, %69 : vector<8x128xf32>
    %103 = arith.mulf %87, %95 : vector<8x128xf32>
    %104 = arith.addf %102, %103 : vector<8x128xf32>
    %105 = math.tanh %104 : vector<8x128xf32>
    %106 = arith.mulf %101, %105 : vector<8x128xf32>
    %107 = arith.index_cast %c2_i32 : i32 to index
    %c0_28 = arith.constant 0 : index
    %c0_29 = arith.constant 0 : index
    %108 = vector.load %arg3[%107, %c0_28, %c0_29] : memref<8x8x128xf32, #tpu.memory_space<vmem>>, vector<1x8x128xf32>
    %109 = vector.shape_cast %108 : vector<1x8x128xf32> to vector<8x128xf32>
    %110 = vector.shape_cast %106 : vector<8x128xf32> to vector<1x8x128xf32>
    tpu.vector_store %arg3[%107, %c0_28, %c0_29], %110 {strides = array<i32>} : memref<8x8x128xf32, #tpu.memory_space<vmem>>, vector<1x8x128xf32>,
    %c3_i32 = arith.constant 3 : i32
    %111 = arith.index_cast %c3_i32 : i32 to index
    %c0_30 = arith.constant 0 : index
    %c0_31 = arith.constant 0 : index
    %112 = vector.load %arg1[%111, %c0_30, %c0_31] : memref<8x8x512xf32, #tpu.memory_space<vmem>>, vector<1x8x512xf32>
    %113 = vector.shape_cast %112 : vector<1x8x512xf32> to vector<8x512xf32>
    %114 = arith.truncf %106 : vector<8x128xf32> to vector<8x128xbf16>
    %cst_32 = arith.constant dense<0.000000e+00> : vector<8x512xf32>
    %115 = tpu.matmul %114, %3, %cst_32 {dimension_numbers = #tpu.dot_dimension_numbers<[1], [0], [0], [1], [0, 0, 1, 1], [], []>} : vector<8x128xbf16>, vector<128x512xbf16>, vector<8x512xf32> -> vector<8x512xf32>
    %116 = arith.addf %113, %115 : vector<8x512xf32>
    %117 = vector.extract_strided_slice %116 {offsets = [0, 0], sizes = [8, 128], strides = [1, 1]} : vector<8x512xf32> to vector<8x128xf32>
    %118 = arith.negf %117 : vector<8x128xf32>
    %119 = math.exp %118 : vector<8x128xf32>
    %cst_33 = arith.constant 1.000000e+00 : f32
    %120 = vector.broadcast %cst_33 : f32 to vector<8x128xf32>
    %121 = arith.addf %120, %119 : vector<8x128xf32>
    %122 = arith.divf %120, %121 : vector<8x128xf32>
    %123 = vector.extract_strided_slice %116 {offsets = [0, 128], sizes = [8, 128], strides = [1, 1]} : vector<8x512xf32> to vector<8x128xf32>
    %124 = arith.negf %123 : vector<8x128xf32>
    %125 = math.exp %124 : vector<8x128xf32>
    %cst_34 = arith.constant 1.000000e+00 : f32
    %126 = vector.broadcast %cst_34 : f32 to vector<8x128xf32>
    %127 = arith.addf %126, %125 : vector<8x128xf32>
    %128 = arith.divf %126, %127 : vector<8x128xf32>
    %129 = vector.extract_strided_slice %116 {offsets = [0, 256], sizes = [8, 128], strides = [1, 1]} : vector<8x512xf32> to vector<8x128xf32>
    %130 = math.tanh %129 : vector<8x128xf32>
    %131 = vector.extract_strided_slice %116 {offsets = [0, 384], sizes = [8, 128], strides = [1, 1]} : vector<8x512xf32> to vector<8x128xf32>
    %132 = arith.negf %131 : vector<8x128xf32>
    %133 = math.exp %132 : vector<8x128xf32>
    %cst_35 = arith.constant 1.000000e+00 : f32
    %134 = vector.broadcast %cst_35 : f32 to vector<8x128xf32>
    %135 = arith.addf %134, %133 : vector<8x128xf32>
    %136 = arith.divf %134, %135 : vector<8x128xf32>
    %137 = arith.mulf %128, %104 : vector<8x128xf32>
    %138 = arith.mulf %122, %130 : vector<8x128xf32>
    %139 = arith.addf %137, %138 : vector<8x128xf32>
    %140 = math.tanh %139 : vector<8x128xf32>
    %141 = arith.mulf %136, %140 : vector<8x128xf32>
    %142 = arith.index_cast %c3_i32 : i32 to index
    %c0_36 = arith.constant 0 : index
    %c0_37 = arith.constant 0 : index
    %143 = vector.load %arg3[%142, %c0_36, %c0_37] : memref<8x8x128xf32, #tpu.memory_space<vmem>>, vector<1x8x128xf32>
    %144 = vector.shape_cast %143 : vector<1x8x128xf32> to vector<8x128xf32>
    %145 = vector.shape_cast %141 : vector<8x128xf32> to vector<1x8x128xf32>
    tpu.vector_store %arg3[%142, %c0_36, %c0_37], %145 {strides = array<i32>} : memref<8x8x128xf32, #tpu.memory_space<vmem>>, vector<1x8x128xf32>,
    %c4_i32 = arith.constant 4 : i32
    %146 = arith.index_cast %c4_i32 : i32 to index
    %c0_38 = arith.constant 0 : index
    %c0_39 = arith.constant 0 : index
    %147 = vector.load %arg1[%146, %c0_38, %c0_39] : memref<8x8x512xf32, #tpu.memory_space<vmem>>, vector<1x8x512xf32>
    %148 = vector.shape_cast %147 : vector<1x8x512xf32> to vector<8x512xf32>
    %149 = arith.truncf %141 : vector<8x128xf32> to vector<8x128xbf16>
    %cst_40 = arith.constant dense<0.000000e+00> : vector<8x512xf32>
    %150 = tpu.matmul %149, %3, %cst_40 {dimension_numbers = #tpu.dot_dimension_numbers<[1], [0], [0], [1], [0, 0, 1, 1], [], []>} : vector<8x128xbf16>, vector<128x512xbf16>, vector<8x512xf32> -> vector<8x512xf32>
    %151 = arith.addf %148, %150 : vector<8x512xf32>
    %152 = vector.extract_strided_slice %151 {offsets = [0, 0], sizes = [8, 128], strides = [1, 1]} : vector<8x512xf32> to vector<8x128xf32>
    %153 = arith.negf %152 : vector<8x128xf32>
    %154 = math.exp %153 : vector<8x128xf32>
    %cst_41 = arith.constant 1.000000e+00 : f32
    %155 = vector.broadcast %cst_41 : f32 to vector<8x128xf32>
    %156 = arith.addf %155, %154 : vector<8x128xf32>
    %157 = arith.divf %155, %156 : vector<8x128xf32>
    %158 = vector.extract_strided_slice %151 {offsets = [0, 128], sizes = [8, 128], strides = [1, 1]} : vector<8x512xf32> to vector<8x128xf32>
    %159 = arith.negf %158 : vector<8x128xf32>
    %160 = math.exp %159 : vector<8x128xf32>
    %cst_42 = arith.constant 1.000000e+00 : f32
    %161 = vector.broadcast %cst_42 : f32 to vector<8x128xf32>
    %162 = arith.addf %161, %160 : vector<8x128xf32>
    %163 = arith.divf %161, %162 : vector<8x128xf32>
    %164 = vector.extract_strided_slice %151 {offsets = [0, 256], sizes = [8, 128], strides = [1, 1]} : vector<8x512xf32> to vector<8x128xf32>
    %165 = math.tanh %164 : vector<8x128xf32>
    %166 = vector.extract_strided_slice %151 {offsets = [0, 384], sizes = [8, 128], strides = [1, 1]} : vector<8x512xf32> to vector<8x128xf32>
    %167 = arith.negf %166 : vector<8x128xf32>
    %168 = math.exp %167 : vector<8x128xf32>
    %cst_43 = arith.constant 1.000000e+00 : f32
    %169 = vector.broadcast %cst_43 : f32 to vector<8x128xf32>
    %170 = arith.addf %169, %168 : vector<8x128xf32>
    %171 = arith.divf %169, %170 : vector<8x128xf32>
    %172 = arith.mulf %163, %139 : vector<8x128xf32>
    %173 = arith.mulf %157, %165 : vector<8x128xf32>
    %174 = arith.addf %172, %173 : vector<8x128xf32>
    %175 = math.tanh %174 : vector<8x128xf32>
    %176 = arith.mulf %171, %175 : vector<8x128xf32>
    %177 = arith.index_cast %c4_i32 : i32 to index
    %c0_44 = arith.constant 0 : index
    %c0_45 = arith.constant 0 : index
    %178 = vector.load %arg3[%177, %c0_44, %c0_45] : memref<8x8x128xf32, #tpu.memory_space<vmem>>, vector<1x8x128xf32>
    %179 = vector.shape_cast %178 : vector<1x8x128xf32> to vector<8x128xf32>
    %180 = vector.shape_cast %176 : vector<8x128xf32> to vector<1x8x128xf32>
    tpu.vector_store %arg3[%177, %c0_44, %c0_45], %180 {strides = array<i32>} : memref<8x8x128xf32, #tpu.memory_space<vmem>>, vector<1x8x128xf32>,
    %c5_i32 = arith.constant 5 : i32
    %181 = arith.index_cast %c5_i32 : i32 to index
    %c0_46 = arith.constant 0 : index
    %c0_47 = arith.constant 0 : index
    %182 = vector.load %arg1[%181, %c0_46, %c0_47] : memref<8x8x512xf32, #tpu.memory_space<vmem>>, vector<1x8x512xf32>
    %183 = vector.shape_cast %182 : vector<1x8x512xf32> to vector<8x512xf32>
    %184 = arith.truncf %176 : vector<8x128xf32> to vector<8x128xbf16>
    %cst_48 = arith.constant dense<0.000000e+00> : vector<8x512xf32>
    %185 = tpu.matmul %184, %3, %cst_48 {dimension_numbers = #tpu.dot_dimension_numbers<[1], [0], [0], [1], [0, 0, 1, 1], [], []>} : vector<8x128xbf16>, vector<128x512xbf16>, vector<8x512xf32> -> vector<8x512xf32>
    %186 = arith.addf %183, %185 : vector<8x512xf32>
    %187 = vector.extract_strided_slice %186 {offsets = [0, 0], sizes = [8, 128], strides = [1, 1]} : vector<8x512xf32> to vector<8x128xf32>
    %188 = arith.negf %187 : vector<8x128xf32>
    %189 = math.exp %188 : vector<8x128xf32>
    %cst_49 = arith.constant 1.000000e+00 : f32
    %190 = vector.broadcast %cst_49 : f32 to vector<8x128xf32>
    %191 = arith.addf %190, %189 : vector<8x128xf32>
    %192 = arith.divf %190, %191 : vector<8x128xf32>
    %193 = vector.extract_strided_slice %186 {offsets = [0, 128], sizes = [8, 128], strides = [1, 1]} : vector<8x512xf32> to vector<8x128xf32>
    %194 = arith.negf %193 : vector<8x128xf32>
    %195 = math.exp %194 : vector<8x128xf32>
    %cst_50 = arith.constant 1.000000e+00 : f32
    %196 = vector.broadcast %cst_50 : f32 to vector<8x128xf32>
    %197 = arith.addf %196, %195 : vector<8x128xf32>
    %198 = arith.divf %196, %197 : vector<8x128xf32>
    %199 = vector.extract_strided_slice %186 {offsets = [0, 256], sizes = [8, 128], strides = [1, 1]} : vector<8x512xf32> to vector<8x128xf32>
    %200 = math.tanh %199 : vector<8x128xf32>
    %201 = vector.extract_strided_slice %186 {offsets = [0, 384], sizes = [8, 128], strides = [1, 1]} : vector<8x512xf32> to vector<8x128xf32>
    %202 = arith.negf %201 : vector<8x128xf32>
    %203 = math.exp %202 : vector<8x128xf32>
    %cst_51 = arith.constant 1.000000e+00 : f32
    %204 = vector.broadcast %cst_51 : f32 to vector<8x128xf32>
    %205 = arith.addf %204, %203 : vector<8x128xf32>
    %206 = arith.divf %204, %205 : vector<8x128xf32>
    %207 = arith.mulf %198, %174 : vector<8x128xf32>
    %208 = arith.mulf %192, %200 : vector<8x128xf32>
    %209 = arith.addf %207, %208 : vector<8x128xf32>
    %210 = math.tanh %209 : vector<8x128xf32>
    %211 = arith.mulf %206, %210 : vector<8x128xf32>
    %212 = arith.index_cast %c5_i32 : i32 to index
    %c0_52 = arith.constant 0 : index
    %c0_53 = arith.constant 0 : index
    %213 = vector.load %arg3[%212, %c0_52, %c0_53] : memref<8x8x128xf32, #tpu.memory_space<vmem>>, vector<1x8x128xf32>
    %214 = vector.shape_cast %213 : vector<1x8x128xf32> to vector<8x128xf32>
    %215 = vector.shape_cast %211 : vector<8x128xf32> to vector<1x8x128xf32>
    tpu.vector_store %arg3[%212, %c0_52, %c0_53], %215 {strides = array<i32>} : memref<8x8x128xf32, #tpu.memory_space<vmem>>, vector<1x8x128xf32>,
    %c6_i32 = arith.constant 6 : i32
    %216 = arith.index_cast %c6_i32 : i32 to index
    %c0_54 = arith.constant 0 : index
    %c0_55 = arith.constant 0 : index
    %217 = vector.load %arg1[%216, %c0_54, %c0_55] : memref<8x8x512xf32, #tpu.memory_space<vmem>>, vector<1x8x512xf32>
    %218 = vector.shape_cast %217 : vector<1x8x512xf32> to vector<8x512xf32>
    %219 = arith.truncf %211 : vector<8x128xf32> to vector<8x128xbf16>
    %cst_56 = arith.constant dense<0.000000e+00> : vector<8x512xf32>
    %220 = tpu.matmul %219, %3, %cst_56 {dimension_numbers = #tpu.dot_dimension_numbers<[1], [0], [0], [1], [0, 0, 1, 1], [], []>} : vector<8x128xbf16>, vector<128x512xbf16>, vector<8x512xf32> -> vector<8x512xf32>
    %221 = arith.addf %218, %220 : vector<8x512xf32>
    %222 = vector.extract_strided_slice %221 {offsets = [0, 0], sizes = [8, 128], strides = [1, 1]} : vector<8x512xf32> to vector<8x128xf32>
    %223 = arith.negf %222 : vector<8x128xf32>
    %224 = math.exp %223 : vector<8x128xf32>
    %cst_57 = arith.constant 1.000000e+00 : f32
    %225 = vector.broadcast %cst_57 : f32 to vector<8x128xf32>
    %226 = arith.addf %225, %224 : vector<8x128xf32>
    %227 = arith.divf %225, %226 : vector<8x128xf32>
    %228 = vector.extract_strided_slice %221 {offsets = [0, 128], sizes = [8, 128], strides = [1, 1]} : vector<8x512xf32> to vector<8x128xf32>
    %229 = arith.negf %228 : vector<8x128xf32>
    %230 = math.exp %229 : vector<8x128xf32>
    %cst_58 = arith.constant 1.000000e+00 : f32
    %231 = vector.broadcast %cst_58 : f32 to vector<8x128xf32>
    %232 = arith.addf %231, %230 : vector<8x128xf32>
    %233 = arith.divf %231, %232 : vector<8x128xf32>
    %234 = vector.extract_strided_slice %221 {offsets = [0, 256], sizes = [8, 128], strides = [1, 1]} : vector<8x512xf32> to vector<8x128xf32>
    %235 = math.tanh %234 : vector<8x128xf32>
    %236 = vector.extract_strided_slice %221 {offsets = [0, 384], sizes = [8, 128], strides = [1, 1]} : vector<8x512xf32> to vector<8x128xf32>
    %237 = arith.negf %236 : vector<8x128xf32>
    %238 = math.exp %237 : vector<8x128xf32>
    %cst_59 = arith.constant 1.000000e+00 : f32
    %239 = vector.broadcast %cst_59 : f32 to vector<8x128xf32>
    %240 = arith.addf %239, %238 : vector<8x128xf32>
    %241 = arith.divf %239, %240 : vector<8x128xf32>
    %242 = arith.mulf %233, %209 : vector<8x128xf32>
    %243 = arith.mulf %227, %235 : vector<8x128xf32>
    %244 = arith.addf %242, %243 : vector<8x128xf32>
    %245 = math.tanh %244 : vector<8x128xf32>
    %246 = arith.mulf %241, %245 : vector<8x128xf32>
    %247 = arith.index_cast %c6_i32 : i32 to index
    %c0_60 = arith.constant 0 : index
    %c0_61 = arith.constant 0 : index
    %248 = vector.load %arg3[%247, %c0_60, %c0_61] : memref<8x8x128xf32, #tpu.memory_space<vmem>>, vector<1x8x128xf32>
    %249 = vector.shape_cast %248 : vector<1x8x128xf32> to vector<8x128xf32>
    %250 = vector.shape_cast %246 : vector<8x128xf32> to vector<1x8x128xf32>
    tpu.vector_store %arg3[%247, %c0_60, %c0_61], %250 {strides = array<i32>} : memref<8x8x128xf32, #tpu.memory_space<vmem>>, vector<1x8x128xf32>,
    %c7_i32 = arith.constant 7 : i32
    %251 = arith.index_cast %c7_i32 : i32 to index
    %c0_62 = arith.constant 0 : index
    %c0_63 = arith.constant 0 : index
    %252 = vector.load %arg1[%251, %c0_62, %c0_63] : memref<8x8x512xf32, #tpu.memory_space<vmem>>, vector<1x8x512xf32>
    %253 = vector.shape_cast %252 : vector<1x8x512xf32> to vector<8x512xf32>
    %254 = arith.truncf %246 : vector<8x128xf32> to vector<8x128xbf16>
    %cst_64 = arith.constant dense<0.000000e+00> : vector<8x512xf32>
    %255 = tpu.matmul %254, %3, %cst_64 {dimension_numbers = #tpu.dot_dimension_numbers<[1], [0], [0], [1], [0, 0, 1, 1], [], []>} : vector<8x128xbf16>, vector<128x512xbf16>, vector<8x512xf32> -> vector<8x512xf32>
    %256 = arith.addf %253, %255 : vector<8x512xf32>
    %257 = vector.extract_strided_slice %256 {offsets = [0, 0], sizes = [8, 128], strides = [1, 1]} : vector<8x512xf32> to vector<8x128xf32>
    %258 = arith.negf %257 : vector<8x128xf32>
    %259 = math.exp %258 : vector<8x128xf32>
    %cst_65 = arith.constant 1.000000e+00 : f32
    %260 = vector.broadcast %cst_65 : f32 to vector<8x128xf32>
    %261 = arith.addf %260, %259 : vector<8x128xf32>
    %262 = arith.divf %260, %261 : vector<8x128xf32>
    %263 = vector.extract_strided_slice %256 {offsets = [0, 128], sizes = [8, 128], strides = [1, 1]} : vector<8x512xf32> to vector<8x128xf32>
    %264 = arith.negf %263 : vector<8x128xf32>
    %265 = math.exp %264 : vector<8x128xf32>
    %cst_66 = arith.constant 1.000000e+00 : f32
    %266 = vector.broadcast %cst_66 : f32 to vector<8x128xf32>
    %267 = arith.addf %266, %265 : vector<8x128xf32>
    %268 = arith.divf %266, %267 : vector<8x128xf32>
    %269 = vector.extract_strided_slice %256 {offsets = [0, 256], sizes = [8, 128], strides = [1, 1]} : vector<8x512xf32> to vector<8x128xf32>
    %270 = math.tanh %269 : vector<8x128xf32>
    %271 = vector.extract_strided_slice %256 {offsets = [0, 384], sizes = [8, 128], strides = [1, 1]} : vector<8x512xf32> to vector<8x128xf32>
    %272 = arith.negf %271 : vector<8x128xf32>
    %273 = math.exp %272 : vector<8x128xf32>
    %cst_67 = arith.constant 1.000000e+00 : f32
    %274 = vector.broadcast %cst_67 : f32 to vector<8x128xf32>
    %275 = arith.addf %274, %273 : vector<8x128xf32>
    %276 = arith.divf %274, %275 : vector<8x128xf32>
    %277 = arith.mulf %268, %244 : vector<8x128xf32>
    %278 = arith.mulf %262, %270 : vector<8x128xf32>
    %279 = arith.addf %277, %278 : vector<8x128xf32>
    %280 = math.tanh %279 : vector<8x128xf32>
    %281 = arith.mulf %276, %280 : vector<8x128xf32>
    %282 = arith.index_cast %c7_i32 : i32 to index
    %c0_68 = arith.constant 0 : index
    %c0_69 = arith.constant 0 : index
    %283 = vector.load %arg3[%282, %c0_68, %c0_69] : memref<8x8x128xf32, #tpu.memory_space<vmem>>, vector<1x8x128xf32>
    %284 = vector.shape_cast %283 : vector<1x8x128xf32> to vector<8x128xf32>
    %285 = vector.shape_cast %281 : vector<8x128xf32> to vector<1x8x128xf32>
    tpu.vector_store %arg3[%282, %c0_68, %c0_69], %285 {strides = array<i32>} : memref<8x8x128xf32, #tpu.memory_space<vmem>>, vector<1x8x128xf32>,
    %c8_i32 = arith.constant 8 : i32
    %c0_70 = arith.constant 0 : index
    %c0_71 = arith.constant 0 : index
    %286 = vector.load %arg4[%c0_70, %c0_71] : memref<8x128xf32, #tpu.memory_space<vmem>>, vector<8x128xf32>
    tpu.vector_store %arg4[%c0_70, %c0_71], %281 {strides = array<i32>} : memref<8x128xf32, #tpu.memory_space<vmem>>, vector<8x128xf32>,
    %c0_72 = arith.constant 0 : index
    %c0_73 = arith.constant 0 : index
    %287 = vector.load %arg5[%c0_72, %c0_73] : memref<8x128xf32, #tpu.memory_space<vmem>>, vector<8x128xf32>
    tpu.vector_store %arg5[%c0_72, %c0_73], %279 {strides = array<i32>} : memref<8x128xf32, #tpu.memory_space<vmem>>, vector<8x128xf32>,
    return
  }
  func.func @transform_0(%arg0: i32) -> (i32, i32, i32) {
    %c0_i32 = arith.constant 0 : i32
    %c0_i32_0 = arith.constant 0 : i32
    %c0_i32_1 = arith.constant 0 : i32
    return %arg0, %c0_i32, %c0_i32_0 : i32, i32, i32
  }
  func.func @transform_1(%arg0: i32) -> (i32, i32) {
    %c0_i32 = arith.constant 0 : i32
    %c0_i32_0 = arith.constant 0 : i32
    %c0_i32_1 = arith.constant 0 : i32
    return %c0_i32, %c0_i32_0 : i32, i32
  }
  func.func @transform_2(%arg0: i32) -> (i32, i32, i32) {
    %c0_i32 = arith.constant 0 : i32
    %c0_i32_0 = arith.constant 0 : i32
    %c0_i32_1 = arith.constant 0 : i32
    return %arg0, %c0_i32, %c0_i32_0 : i32, i32, i32
  }
}

module attributes {stable_mosaic.version = 11 : i64} {
  func.func @_matmul_kernel(%arg0: i32, %arg1: i32, %arg2: memref<64x128xf32, #tpu.memory_space<vmem>>, %arg3: memref<128x256xbf16, #tpu.memory_space<vmem>>, %arg4: memref<64x256xf32, #tpu.memory_space<vmem>>) attributes {dimension_semantics = [#tpu.dimension_semantics<parallel>, #tpu.dimension_semantics<parallel>], iteration_bounds = array<i64: 1, 1>, scalar_prefetch = 0 : i64, scratch_operands = 0 : i64, tpu.core_type = #tpu.core_type<tc>, window_params = [{transform_indices = @transform_0, window_bounds = array<i64: 64, 128>}, {transform_indices = @transform_1, window_bounds = array<i64: 128, 256>}, {transform_indices = @transform_2, window_bounds = array<i64: 64, 256>}]} {
    %c0 = arith.constant 0 : index
    %c0_0 = arith.constant 0 : index
    %0 = vector.load %arg3[%c0, %c0_0] : memref<128x256xbf16, #tpu.memory_space<vmem>>, vector<128x256xbf16>
    %c0_1 = arith.constant 0 : index
    %c0_2 = arith.constant 0 : index
    %1 = vector.load %arg2[%c0_1, %c0_2] : memref<64x128xf32, #tpu.memory_space<vmem>>, vector<64x128xf32>
    %2 = arith.truncf %1 : vector<64x128xf32> to vector<64x128xbf16>
    %cst = arith.constant dense<0.000000e+00> : vector<64x256xf32>
    %3 = tpu.matmul %2, %0, %cst {dimension_numbers = #tpu.dot_dimension_numbers<[1], [0], [0], [1], [0, 0, 1, 1], [], []>} : vector<64x128xbf16>, vector<128x256xbf16>, vector<64x256xf32> -> vector<64x256xf32>
    %c0_3 = arith.constant 0 : index
    %c0_4 = arith.constant 0 : index
    %4 = vector.load %arg4[%c0_3, %c0_4] : memref<64x256xf32, #tpu.memory_space<vmem>>, vector<64x256xf32>
    tpu.vector_store %arg4[%c0_3, %c0_4], %3 {strides = array<i32>} : memref<64x256xf32, #tpu.memory_space<vmem>>, vector<64x256xf32>,
    return
  }
  func.func @transform_0(%arg0: i32, %arg1: i32) -> (i32, i32) {
    %c0_i32 = arith.constant 0 : i32
    %c0_i32_0 = arith.constant 0 : i32
    return %arg0, %c0_i32 : i32, i32
  }
  func.func @transform_1(%arg0: i32, %arg1: i32) -> (i32, i32) {
    %c0_i32 = arith.constant 0 : i32
    %c0_i32_0 = arith.constant 0 : i32
    return %c0_i32, %arg1 : i32, i32
  }
  func.func @transform_2(%arg0: i32, %arg1: i32) -> (i32, i32) {
    %c0_i32 = arith.constant 0 : i32
    return %arg0, %arg1 : i32, i32
  }
}

</mosaic_0001>

<bundles_post_ra>
// kernel: lstm_model_forward.9
= control target key start
LH: loop header
LB: loop body
LE: loop exit
PB: predicated region body
PF: predicated region fallthrough
CT: control target
= control target key end

     0   :  { %v310_v2 = vmov 0   ;;  %s413_s0 = inlined_call_operand.vmem [shape: f32[64,128], index: 0, kind: input, shape index: {}]   ;;  %s414_s1 = inlined_call_operand.vmem [shape: bf16[128,256], index: 1, kind: input, shape index: {}]   ;;  %s415_s2 = inlined_call_operand.hbm [shape: f32[64,256], index: 2, kind: output, shape index: {}]  }
   0x1   :  { %v262_v0 = vld [vmem:[%s414_s1 + $0x4] ss:$8 sps:$4 sm:$0xff]   ;;  %v264_v1 = vld [vmem:[%s414_s1] ss:$8 sps:$4 sm:$0xff]   ;;  %153 = vmatprep.mubr.bf16.mxu0 %v310_v2  ;;  %173 = vmatprep.mubr.bf16.mxu1 %v310_v2  ;;  %v265_v3 = vld [vmem:[%s414_s1 + $0x14] ss:$8 sps:$4 sm:$0xff]  }
   0x2   :  { %121 = vmatprep.subr.bf16.mxu0 %v262_v0  ;;  %242 = vmatprep.subr.bf16.mxu1 %v262_v0  ;;  %v267_v4 = vld [vmem:[%s414_s1 + $0x10] ss:$8 sps:$4 sm:$0xff]   ;;  %v268_v5 = vld [vmem:[%s414_s1 + $0x24] ss:$8 sps:$4 sm:$0xff]   ;;  %v270_v6 = vld [vmem:[%s414_s1 + $0x20] ss:$8 sps:$4 sm:$0xff]  }
   0x3   :  { %122 = vmatpush1.bf16.msra.mxu0 %v264_v1  ;;  %250 = vmatpush1.bf16.msra.mxu1 %v264_v1  ;;  %v271_v7 = vld [vmem:[%s414_s1 + $0x34] ss:$8 sps:$4 sm:$0xff]   ;;  %v273_v8 = vld [vmem:[%s414_s1 + $0x30] ss:$8 sps:$4 sm:$0xff]   ;;  %v274_v9 = vld [vmem:[%s414_s1 + $0x44] ss:$8 sps:$4 sm:$0xff]  }
   0x4   :  { %123 = vmatprep.subr.bf16.mxu0 %v265_v3  ;;  %243 = vmatprep.subr.bf16.mxu1 %v265_v3 }
   0x7   :  { %124 = vmatpush1.bf16.msra.mxu0 %v267_v4  ;;  %251 = vmatpush1.bf16.msra.mxu1 %v267_v4 }
   0x8   :  { %125 = vmatprep.subr.bf16.mxu0 %v268_v5  ;;  %244 = vmatprep.subr.bf16.mxu1 %v268_v5 }
   0xb   :  { %126 = vmatpush1.bf16.msra.mxu0 %v270_v6  ;;  %252 = vmatpush1.bf16.msra.mxu1 %v270_v6 }
   0xc   :  { %127 = vmatprep.subr.bf16.mxu0 %v271_v7  ;;  %245 = vmatprep.subr.bf16.mxu1 %v271_v7 }
   0xd   :  { %7 = vsyncpa [#allocation3], 0  ;;  %v276_v10 = vld [vmem:[%s414_s1 + $0x40] ss:$8 sps:$4 sm:$0xff]   ;;  %v277_v11 = vld [vmem:[%s414_s1 + $0x54] ss:$8 sps:$4 sm:$0xff]  }
   0xe   :  { %v279_v12 = vld [vmem:[%s414_s1 + $0x50] ss:$8 sps:$4 sm:$0xff]   ;;  %v280_v13 = vld [vmem:[%s414_s1 + $0x64] ss:$8 sps:$4 sm:$0xff]   ;;  %v282_v14 = vld [vmem:[%s414_s1 + $0x60] ss:$8 sps:$4 sm:$0xff]  }
   0xf   :  { %128 = vmatpush1.bf16.msra.mxu0 %v273_v8  ;;  %253 = vmatpush1.bf16.msra.mxu1 %v273_v8  ;;  %v283_v15 = vld [vmem:[%s414_s1 + $0x74] ss:$8 sps:$4 sm:$0xff]   ;;  %v285_v16 = vld [vmem:[%s414_s1 + $0x70] ss:$8 sps:$4 sm:$0xff]   ;;  %v29_v17 = vld [vmem:[%s413_s0] sm:$0xff] }
  0x10   :  { %129 = vmatprep.subr.bf16.mxu0 %v274_v9  ;;  %246 = vmatprep.subr.bf16.mxu1 %v274_v9  ;;  %v30_v18 = vld [vmem:[%s413_s0 + $0x8] sm:$0xff]  ;;  %v33_v19 = vld [vmem:[%s413_s0 + $0x20] sm:$0xff]  ;;  %v31_v23 = vld [vmem:[%s413_s0 + $0x10] sm:$0xff] }
  0x11   :  { %v34_v20 = vld [vmem:[%s413_s0 + $0x28] sm:$0xff]  ;;  %v37_v21 = vpack.c.bf16 %v30_v18, %v29_v17  ;;  %v32_v24 = vld [vmem:[%s413_s0 + $0x18] sm:$0xff]  ;;  %v35_v25 = vld [vmem:[%s413_s0 + $0x30] sm:$0xff] }
  0x12   :  { %v39_v22 = vpack.c.bf16 %v34_v20, %v33_v19  ;;  %v36_v26 = vld [vmem:[%s413_s0 + $0x38] sm:$0xff]  ;;  %v38_v27 = vpack.c.bf16 %v32_v24, %v31_v23  ;;  %s311_s0 = smov [#allocation2]  }
  0x13   :  { %130 = vmatpush1.bf16.msra.mxu0 %v276_v10  ;;  %254 = vmatpush1.bf16.msra.mxu1 %v276_v10  ;;  %v40_v28 = vpack.c.bf16 %v36_v26, %v35_v25  ;;  %s215_s28 = sshll.u32 %s311_s0, 4  ;;  %s216_s28 = int_to_ptr.vmem [resolvable:$true] %s215_s28 }
  0x14   :  { %131 = vmatprep.subr.bf16.mxu0 %v277_v11  ;;  %247 = vmatprep.subr.bf16.mxu1 %v277_v11  ;;  %s286_s29 = scalar_lea.vmem %s216_s28, 2048  ;;  %p291_p1 = scmp.lt.s32.totalorder %s216_s28, %s216_s28 }
  0x15   :  { %p287_p0 = scmp.ne.s32.totalorder %s216_s28, %s286_s29  ;;  %p292_p2 = scmp.lt.s32.totalorder %s286_s29, %s286_s29 }
  0x17   :  { %132 = vmatpush1.bf16.msra.mxu0 %v279_v12  ;;  %255 = vmatpush1.bf16.msra.mxu1 %v279_v12  ;;  %p293_p3 = por %p292_p2, %p291_p1 }
  0x18   :  { %133 = vmatprep.subr.bf16.mxu0 %v280_v13  ;;  %248 = vmatprep.subr.bf16.mxu1 %v280_v13 }
  0x19   :  { %p294_p4 = pnand %p293_p3, %p287_p0 }
  0x1b   :  { %134 = vmatpush1.bf16.msra.mxu0 %v282_v14  ;;  %256 = vmatpush1.bf16.msra.mxu1 %v282_v14 }
  0x1c   :  { %135 = vmatprep.subr.bf16.mxu0 %v283_v15  ;;  %249 = vmatprep.subr.bf16.mxu1 %v283_v15 }
  0x1f   :  { %136 = vmatpush1.bf16.msra.mxu0 %v285_v16  ;;  %257 = vmatpush1.bf16.msra.mxu1 %v285_v16 }
  0x22   :  { %154 = vmatmul.mubr.bf16.vlgmr.msra.gmra.mrb[0].mxu0 %v37_v21  ;;  %174 = vmatmul.mubr.bf16.vlgmr.msra.gmra.mrb[0].mxu1 %v39_v22 }
  0x23   :  { %163 = vmatprep.mubr.bf16.mxu0 %v310_v2  ;;  %183 = vmatprep.mubr.bf16.mxu1 %v310_v2 }
  0x2a   :  { %164 = vmatmul.mubr.bf16.gmra.mrb[4].mxu0 %v38_v27  ;;  %184 = vmatmul.mubr.bf16.gmra.mrb[4].mxu1 %v40_v28 }
  0xf5   :  { %v155_v29 = vpop.f32.mrb[0].mxu0  ;;  %v175_v30 = vpop.f32.mrb[0].mxu1 }
  0xf6   :  { %194 = vst [vmem:[#allocation2] sm:$0xff] %v155_v29  ;;  %202 = vst [vmem:[#allocation2 + $0x40] sm:$0xff] %v175_v30  ;;  %v157_v31 = vpop.f32.mrb[1].mxu0  ;;  %v177_v32 = vpop.f32.mrb[1].mxu1 }
  0xf7   :  { %195 = vst [vmem:[#allocation2 + $0x8] sm:$0xff] %v157_v31  ;;  %203 = vst [vmem:[#allocation2 + $0x48] sm:$0xff] %v177_v32  ;;  %v159_v33 = vpop.f32.mrb[2].mxu0  ;;  %v179_v34 = vpop.f32.mrb[2].mxu1 }
  0xf8   :  { %196 = vst [vmem:[#allocation2 + $0x10] sm:$0xff] %v159_v33  ;;  %204 = vst [vmem:[#allocation2 + $0x50] sm:$0xff] %v179_v34  ;;  %v161_v35 = vpop.f32.mrb[3].mxu0  ;;  %v181_v36 = vpop.f32.mrb[3].mxu1 }
  0xf9   :  { %197 = vst [vmem:[#allocation2 + $0x18] sm:$0xff] %v161_v35  ;;  %205 = vst [vmem:[#allocation2 + $0x58] sm:$0xff] %v181_v36 }
  0xfd   :  { %v165_v37 = vpop.f32.mrb[4].mxu0  ;;  %v185_v38 = vpop.f32.mrb[4].mxu1 }
  0xfe   :  { %198 = vst [vmem:[#allocation2 + $0x20] sm:$0xff] %v165_v37  ;;  %206 = vst [vmem:[#allocation2 + $0x60] sm:$0xff] %v185_v38  ;;  %v167_v39 = vpop.f32.mrb[5].mxu0  ;;  %v187_v40 = vpop.f32.mrb[5].mxu1 }
  0xff   :  { %199 = vst [vmem:[#allocation2 + $0x28] sm:$0xff] %v167_v39  ;;  %207 = vst [vmem:[#allocation2 + $0x68] sm:$0xff] %v187_v40  ;;  %v169_v41 = vpop.f32.mrb[6].mxu0  ;;  %v189_v42 = vpop.f32.mrb[6].mxu1 }
 0x100   :  { %200 = vst [vmem:[#allocation2 + $0x30] sm:$0xff] %v169_v41  ;;  %208 = vst [vmem:[#allocation2 + $0x70] sm:$0xff] %v189_v42  ;;  %v171_v43 = vpop.f32.mrb[7].mxu0  ;;  %v191_v44 = vpop.f32.mrb[7].mxu1 }
 0x101   :  { %201 = vst [vmem:[#allocation2 + $0x38] sm:$0xff] %v171_v43  ;;  %209 = vst [vmem:[#allocation2 + $0x78] sm:$0xff] %v191_v44 }
 0x102   :  { %297 = shalt.err (!%p294_p4)
}
 0x103   :  { %s298_s4 = scalar_lea.hbm %s415_s2, 2048 }
 0x104   :  { %p299_p5 = scmp.ne.s32.totalorder %s415_s2, %s298_s4  ;;  %p302_p6 = scmp.lt.u32.totalorder %s298_s4, %s415_s2 }
 0x106   :  { %p304_p7 = pnand %p302_p6, %p299_p5 }
 0x108   :  { %307 = shalt.err (!%p304_p7)
}
 0x109   :  { %s312_s9 = smov 256   ;;  %s313_s10 = smov 16  }
 0x10a   :  { %221 = dma.vmem_to_hbm [thread:$0]  %s216_s28, 2048, %s415_s2, [#allocation3], %s312_s9, %s312_s9, %s313_s10  }
 0x10b   :  { %308 = dma.done.wait [#allocation3], 2048  }
 0x10c   :  { %309 = vsyncadd [#allocation3], 4294965248 }
 0x10d   :  { %225 = vsyncpa [#allocation3], 1 }

// kernel: lstm_model_forward.5
= control target key start
LH: loop header
LB: loop body
LE: loop exit
PB: predicated region body
PF: predicated region fallthrough
CT: control target
= control target key end

     0   :  { %v504_v1 = vmov 0   ;;  %v61_v45 = vlaneseq  ;;  %s792_s1 = inlined_call_operand.vmem [shape: bf16[128,512], index: 1, kind: input, shape index: {}]   ;;  %s793_s0 = inlined_call_operand.vmem [shape: f32[64,128], index: 0, kind: input, shape index: {}]   ;;  %s794_s2 = inlined_call_operand.vmem [shape: f32[1,512], index: 2, kind: input, shape index: {}]   ;;  %s795_s3 = inlined_call_operand.vmem [shape: f32[64,512], index: 3, kind: output, shape index: {}]  }
   0x1   :  { %v456_v0 = vld [vmem:[%s792_s1 + $0x4] ss:$16 sps:$4 sm:$0xff]   ;;  %273 = vmatprep.mubr.bf16.mxu0 %v504_v1  ;;  %346 = vmatprep.mubr.bf16.mxu1 %v504_v1  ;;  %v458_v2 = vld [vmem:[%s792_s1 + $0xc] ss:$16 sps:$4 sm:$0xff]   ;;  %v460_v3 = vld [vmem:[%s792_s1] ss:$16 sps:$4 sm:$0xff]  }
   0x2   :  { %241 = vmatprep.subr.bf16.mxu0 %v456_v0  ;;  %v461_v4 = vld [vmem:[%s792_s1 + $0x8] ss:$16 sps:$4 sm:$0xff]   ;;  %314 = vmatprep.subr.bf16.mxu1 %v458_v2  ;;  %v462_v5 = vld [vmem:[%s792_s1 + $0x24] ss:$16 sps:$4 sm:$0xff]   ;;  %v464_v6 = vld [vmem:[%s792_s1 + $0x2c] ss:$16 sps:$4 sm:$0xff]  }
   0x3   :  { %242 = vmatpush1.bf16.msra.mxu0 %v460_v3  ;;  %315 = vmatpush1.bf16.msra.mxu1 %v461_v4  ;;  %v466_v7 = vld [vmem:[%s792_s1 + $0x20] ss:$16 sps:$4 sm:$0xff]   ;;  %v467_v8 = vld [vmem:[%s792_s1 + $0x28] ss:$16 sps:$4 sm:$0xff]   ;;  %v468_v9 = vld [vmem:[%s792_s1 + $0x44] ss:$16 sps:$4 sm:$0xff]  }
   0x4   :  { %243 = vmatprep.subr.bf16.mxu0 %v462_v5  ;;  %316 = vmatprep.subr.bf16.mxu1 %v464_v6  ;;  %v470_v10 = vld [vmem:[%s792_s1 + $0x4c] ss:$16 sps:$4 sm:$0xff]   ;;  %v472_v11 = vld [vmem:[%s792_s1 + $0x40] ss:$16 sps:$4 sm:$0xff]   ;;  %v473_v12 = vld [vmem:[%s792_s1 + $0x48] ss:$16 sps:$4 sm:$0xff]  }
   0x5   :  { %v474_v13 = vld [vmem:[%s792_s1 + $0x64] ss:$16 sps:$4 sm:$0xff]   ;;  %v476_v14 = vld [vmem:[%s792_s1 + $0x6c] ss:$16 sps:$4 sm:$0xff]   ;;  %v478_v15 = vld [vmem:[%s792_s1 + $0x60] ss:$16 sps:$4 sm:$0xff]  }
   0x6   :  { %v479_v16 = vld [vmem:[%s792_s1 + $0x68] ss:$16 sps:$4 sm:$0xff]   ;;  %v480_v17 = vld [vmem:[%s792_s1 + $0x84] ss:$16 sps:$4 sm:$0xff]   ;;  %v482_v18 = vld [vmem:[%s792_s1 + $0x8c] ss:$16 sps:$4 sm:$0xff]  }
   0x7   :  { %244 = vmatpush1.bf16.msra.mxu0 %v466_v7  ;;  %317 = vmatpush1.bf16.msra.mxu1 %v467_v8  ;;  %v484_v19 = vld [vmem:[%s792_s1 + $0x80] ss:$16 sps:$4 sm:$0xff]   ;;  %v485_v20 = vld [vmem:[%s792_s1 + $0x88] ss:$16 sps:$4 sm:$0xff]   ;;  %v486_v21 = vld [vmem:[%s792_s1 + $0xa4] ss:$16 sps:$4 sm:$0xff]  }
   0x8   :  { %245 = vmatprep.subr.bf16.mxu0 %v468_v9  ;;  %318 = vmatprep.subr.bf16.mxu1 %v470_v10  ;;  %v488_v22 = vld [vmem:[%s792_s1 + $0xac] ss:$16 sps:$4 sm:$0xff]   ;;  %v490_v23 = vld [vmem:[%s792_s1 + $0xa0] ss:$16 sps:$4 sm:$0xff]   ;;  %v491_v24 = vld [vmem:[%s792_s1 + $0xa8] ss:$16 sps:$4 sm:$0xff]  }
   0x9   :  { %v492_v25 = vld [vmem:[%s792_s1 + $0xc4] ss:$16 sps:$4 sm:$0xff]   ;;  %v494_v26 = vld [vmem:[%s792_s1 + $0xcc] ss:$16 sps:$4 sm:$0xff]   ;;  %v496_v27 = vld [vmem:[%s792_s1 + $0xc0] ss:$16 sps:$4 sm:$0xff]  }
   0xa   :  { %v497_v28 = vld [vmem:[%s792_s1 + $0xc8] ss:$16 sps:$4 sm:$0xff]   ;;  %v498_v29 = vld [vmem:[%s792_s1 + $0xe4] ss:$16 sps:$4 sm:$0xff]   ;;  %v500_v30 = vld [vmem:[%s792_s1 + $0xec] ss:$16 sps:$4 sm:$0xff]  }
   0xb   :  { %246 = vmatpush1.bf16.msra.mxu0 %v472_v11  ;;  %319 = vmatpush1.bf16.msra.mxu1 %v473_v12  ;;  %v502_v31 = vld [vmem:[%s792_s1 + $0xe0] ss:$16 sps:$4 sm:$0xff]   ;;  %v503_v32 = vld [vmem:[%s792_s1 + $0xe8] ss:$16 sps:$4 sm:$0xff]   ;;  %v62_v46 = vshrl.u32 %v61_v45, 7 }
   0xc   :  { %247 = vmatprep.subr.bf16.mxu0 %v474_v13  ;;  %320 = vmatprep.subr.bf16.mxu1 %v476_v14  ;;  %v47_v33 = vld [vmem:[%s793_s0] sm:$0xff]  ;;  %v48_v34 = vld [vmem:[%s793_s0 + $0x8] sm:$0xff]  ;;  %v49_v36 = vld [vmem:[%s793_s0 + $0x10] sm:$0xff] }
   0xd   :  { %v55_v35 = vpack.c.bf16 %v48_v34, %v47_v33  ;;  %v50_v37 = vld [vmem:[%s793_s0 + $0x18] sm:$0xff]  ;;  %v51_v39 = vld [vmem:[%s793_s0 + $0x20] sm:$0xff]  ;;  %v52_v40 = vld [vmem:[%s793_s0 + $0x28] sm:$0xff]  ;;  %v63_v47 = vsub.s32 0, %v62_v46  ;;  %v71_v48 = vsub.s32 2, %v62_v46  ;;  %v67_v50 = vsub.s32 1, %v62_v46 }
   0xe   :  { %v56_v38 = vpack.c.bf16 %v50_v37, %v49_v36  ;;  %v57_v41 = vpack.c.bf16 %v52_v40, %v51_v39  ;;  %v53_v42 = vld [vmem:[%s793_s0 + $0x30] sm:$0xff]  ;;  %v54_v43 = vld [vmem:[%s793_s0 + $0x38] sm:$0xff]  ;;  %v59_v49 = vld [vmem:[%s794_s2] sm:$0xf]  ;;  %v75_v51 = vsub.s32 3, %v62_v46 }
   0xf   :  { %248 = vmatpush1.bf16.msra.mxu0 %v478_v15  ;;  %321 = vmatpush1.bf16.msra.mxu1 %v479_v16  ;;  %v58_v44 = vpack.c.bf16 %v54_v43, %v53_v42  ;;  %v656_v52 = vrot.slane %v59_v49, %v63_v47  ;;  %v658_v53 = vrot.slane %v59_v49, %v71_v48 }
  0x10   :  { %249 = vmatprep.subr.bf16.mxu0 %v480_v17  ;;  %322 = vmatprep.subr.bf16.mxu1 %v482_v18  ;;  %v660_v54 = vrot.slane %v59_v49, %v67_v50  ;;  %v662_v55 = vrot.slane %v59_v49, %v75_v51 }
  0x13   :  { %250 = vmatpush1.bf16.msra.mxu0 %v484_v19  ;;  %323 = vmatpush1.bf16.msra.mxu1 %v485_v20 }
  0x14   :  { %251 = vmatprep.subr.bf16.mxu0 %v486_v21  ;;  %324 = vmatprep.subr.bf16.mxu1 %v488_v22 }
  0x17   :  { %252 = vmatpush1.bf16.msra.mxu0 %v490_v23  ;;  %325 = vmatpush1.bf16.msra.mxu1 %v491_v24 }
  0x18   :  { %253 = vmatprep.subr.bf16.mxu0 %v492_v25  ;;  %326 = vmatprep.subr.bf16.mxu1 %v494_v26 }
  0x1b   :  { %254 = vmatpush1.bf16.msra.mxu0 %v496_v27  ;;  %327 = vmatpush1.bf16.msra.mxu1 %v497_v28 }
  0x1c   :  { %255 = vmatprep.subr.bf16.mxu0 %v498_v29  ;;  %328 = vmatprep.subr.bf16.mxu1 %v500_v30 }
  0x1f   :  { %256 = vmatpush1.bf16.msra.mxu0 %v502_v31  ;;  %329 = vmatpush1.bf16.msra.mxu1 %v503_v32 }
  0x22   :  { %274 = vmatmul.mubr.bf16.vlgmr.msra.gmra.mrb[0].mxu0 %v55_v35  ;;  %347 = vmatmul.mubr.bf16.vlgmr.msra.gmra.mrb[0].mxu1 %v55_v35 }
  0x23   :  { %283 = vmatprep.mubr.bf16.mxu0 %v504_v1  ;;  %356 = vmatprep.mubr.bf16.mxu1 %v504_v1 }
  0x2a   :  { %284 = vmatmul.mubr.bf16.gmra.mrb[4].mxu0 %v56_v38  ;;  %357 = vmatmul.mubr.bf16.gmra.mrb[4].mxu1 %v56_v38 }
  0x2b   :  { %293 = vmatprep.mubr.bf16.mxu0 %v504_v1  ;;  %366 = vmatprep.mubr.bf16.mxu1 %v504_v1 }
  0x32   :  { %294 = vmatmul.mubr.bf16.gmra.mrb[8].mxu0 %v57_v41  ;;  %367 = vmatmul.mubr.bf16.gmra.mrb[8].mxu1 %v57_v41 }
  0x33   :  { %303 = vmatprep.mubr.bf16.mxu0 %v504_v1  ;;  %376 = vmatprep.mubr.bf16.mxu1 %v504_v1 }
  0x3a   :  { %304 = vmatmul.mubr.bf16.gmra.mrb[12].mxu0 %v58_v44  ;;  %377 = vmatmul.mubr.bf16.gmra.mrb[12].mxu1 %v58_v44 }
  0xf5   :  { %v275_v56 = vpop.f32.mrb[0].mxu0  ;;  %v348_v57 = vpop.f32.mrb[0].mxu1 }
  0xf6   :  { %v276_v58 = vadd.f32 %v275_v56, %v656_v52  ;;  %v349_v59 = vadd.f32 %v348_v57, %v658_v53  ;;  %v277_v60 = vpop.f32.mrb[1].mxu0  ;;  %v350_v61 = vpop.f32.mrb[1].mxu1 }
  0xf7   :  { %v278_v62 = vadd.f32 %v277_v60, %v660_v54  ;;  %v351_v63 = vadd.f32 %v350_v61, %v662_v55  ;;  %v279_v0 = vpop.f32.mrb[2].mxu0  ;;  %v352_v1 = vpop.f32.mrb[2].mxu1 }
  0xf8   :  { %387 = vst [vmem:[%s795_s3] sm:$0xff] %v276_v58  ;;  %389 = vst [vmem:[%s795_s3 + $0x10] sm:$0xff] %v349_v59  ;;  %v280_v2 = vadd.f32 %v279_v0, %v656_v52  ;;  %v353_v3 = vadd.f32 %v352_v1, %v658_v53  ;;  %v281_v4 = vpop.f32.mrb[3].mxu0  ;;  %v354_v5 = vpop.f32.mrb[3].mxu1 }
  0xf9   :  { %388 = vst [vmem:[%s795_s3 + $0x8] sm:$0xff] %v278_v62  ;;  %390 = vst [vmem:[%s795_s3 + $0x18] sm:$0xff] %v351_v63  ;;  %v282_v6 = vadd.f32 %v281_v4, %v660_v54  ;;  %v355_v7 = vadd.f32 %v354_v5, %v662_v55 }
  0xfa   :  { %391 = vst [vmem:[%s795_s3 + $0x20] sm:$0xff] %v280_v2  ;;  %393 = vst [vmem:[%s795_s3 + $0x30] sm:$0xff] %v353_v3 }
  0xfb   :  { %392 = vst [vmem:[%s795_s3 + $0x28] sm:$0xff] %v282_v6  ;;  %394 = vst [vmem:[%s795_s3 + $0x38] sm:$0xff] %v355_v7 }
  0xfd   :  { %v285_v8 = vpop.f32.mrb[4].mxu0  ;;  %v358_v9 = vpop.f32.mrb[4].mxu1 }
  0xfe   :  { %v286_v10 = vadd.f32 %v285_v8, %v656_v52  ;;  %v359_v11 = vadd.f32 %v358_v9, %v658_v53  ;;  %v287_v12 = vpop.f32.mrb[5].mxu0  ;;  %v360_v13 = vpop.f32.mrb[5].mxu1 }
  0xff   :  { %v288_v14 = vadd.f32 %v287_v12, %v660_v54  ;;  %v361_v15 = vadd.f32 %v360_v13, %v662_v55  ;;  %v289_v16 = vpop.f32.mrb[6].mxu0  ;;  %v362_v17 = vpop.f32.mrb[6].mxu1 }
 0x100   :  { %395 = vst [vmem:[%s795_s3 + $0x40] sm:$0xff] %v286_v10  ;;  %397 = vst [vmem:[%s795_s3 + $0x50] sm:$0xff] %v359_v11  ;;  %v290_v18 = vadd.f32 %v289_v16, %v656_v52  ;;  %v363_v19 = vadd.f32 %v362_v17, %v658_v53  ;;  %v291_v20 = vpop.f32.mrb[7].mxu0  ;;  %v364_v21 = vpop.f32.mrb[7].mxu1 }
 0x101   :  { %396 = vst [vmem:[%s795_s3 + $0x48] sm:$0xff] %v288_v14  ;;  %398 = vst [vmem:[%s795_s3 + $0x58] sm:$0xff] %v361_v15  ;;  %v292_v22 = vadd.f32 %v291_v20, %v660_v54  ;;  %v365_v23 = vadd.f32 %v364_v21, %v662_v55 }
 0x102   :  { %399 = vst [vmem:[%s795_s3 + $0x60] sm:$0xff] %v290_v18  ;;  %401 = vst [vmem:[%s795_s3 + $0x70] sm:$0xff] %v363_v19 }
 0x103   :  { %400 = vst [vmem:[%s795_s3 + $0x68] sm:$0xff] %v292_v22  ;;  %402 = vst [vmem:[%s795_s3 + $0x78] sm:$0xff] %v365_v23 }
 0x105   :  { %v295_v24 = vpop.f32.mrb[8].mxu0  ;;  %v368_v25 = vpop.f32.mrb[8].mxu1 }
 0x106   :  { %v296_v26 = vadd.f32 %v295_v24, %v656_v52  ;;  %v369_v27 = vadd.f32 %v368_v25, %v658_v53  ;;  %v297_v28 = vpop.f32.mrb[9].mxu0  ;;  %v370_v29 = vpop.f32.mrb[9].mxu1 }
 0x107   :  { %v298_v30 = vadd.f32 %v297_v28, %v660_v54  ;;  %v371_v31 = vadd.f32 %v370_v29, %v662_v55  ;;  %v299_v32 = vpop.f32.mrb[10].mxu0  ;;  %v372_v33 = vpop.f32.mrb[10].mxu1 }
 0x108   :  { %403 = vst [vmem:[%s795_s3 + $0x80] sm:$0xff] %v296_v26  ;;  %405 = vst [vmem:[%s795_s3 + $0x90] sm:$0xff] %v369_v27  ;;  %v300_v34 = vadd.f32 %v299_v32, %v656_v52  ;;  %v373_v35 = vadd.f32 %v372_v33, %v658_v53  ;;  %v301_v36 = vpop.f32.mrb[11].mxu0  ;;  %v374_v37 = vpop.f32.mrb[11].mxu1 }
 0x109   :  { %404 = vst [vmem:[%s795_s3 + $0x88] sm:$0xff] %v298_v30  ;;  %406 = vst [vmem:[%s795_s3 + $0x98] sm:$0xff] %v371_v31  ;;  %v302_v38 = vadd.f32 %v301_v36, %v660_v54  ;;  %v375_v39 = vadd.f32 %v374_v37, %v662_v55 }
 0x10a   :  { %407 = vst [vmem:[%s795_s3 + $0xa0] sm:$0xff] %v300_v34  ;;  %409 = vst [vmem:[%s795_s3 + $0xb0] sm:$0xff] %v373_v35 }
 0x10b   :  { %408 = vst [vmem:[%s795_s3 + $0xa8] sm:$0xff] %v302_v38  ;;  %410 = vst [vmem:[%s795_s3 + $0xb8] sm:$0xff] %v375_v39 }
 0x10d   :  { %v305_v40 = vpop.f32.mrb[12].mxu0  ;;  %v378_v41 = vpop.f32.mrb[12].mxu1 }
 0x10e   :  { %v306_v42 = vadd.f32 %v305_v40, %v656_v52  ;;  %v379_v43 = vadd.f32 %v378_v41, %v658_v53  ;;  %v307_v44 = vpop.f32.mrb[13].mxu0  ;;  %v380_v45 = vpop.f32.mrb[13].mxu1 }
 0x10f   :  { %v308_v46 = vadd.f32 %v307_v44, %v660_v54  ;;  %v381_v47 = vadd.f32 %v380_v45, %v662_v55  ;;  %v309_v48 = vpop.f32.mrb[14].mxu0  ;;  %v382_v49 = vpop.f32.mrb[14].mxu1 }
 0x110   :  { %411 = vst [vmem:[%s795_s3 + $0xc0] sm:$0xff] %v306_v42  ;;  %413 = vst [vmem:[%s795_s3 + $0xd0] sm:$0xff] %v379_v43  ;;  %v310_v50 = vadd.f32 %v309_v48, %v656_v52  ;;  %v383_v51 = vadd.f32 %v382_v49, %v658_v53  ;;  %v311_v56 = vpop.f32.mrb[15].mxu0  ;;  %v384_v57 = vpop.f32.mrb[15].mxu1 }
 0x111   :  { %412 = vst [vmem:[%s795_s3 + $0xc8] sm:$0xff] %v308_v46  ;;  %414 = vst [vmem:[%s795_s3 + $0xd8] sm:$0xff] %v381_v47  ;;  %v312_v58 = vadd.f32 %v311_v56, %v660_v54  ;;  %v385_v59 = vadd.f32 %v384_v57, %v662_v55 }
 0x112   :  { %415 = vst [vmem:[%s795_s3 + $0xe0] sm:$0xff] %v310_v50  ;;  %417 = vst [vmem:[%s795_s3 + $0xf0] sm:$0xff] %v383_v51 }
 0x113   :  { %416 = vst [vmem:[%s795_s3 + $0xe8] sm:$0xff] %v312_v58  ;;  %418 = vst [vmem:[%s795_s3 + $0xf8] sm:$0xff] %v385_v59 }

// kernel: lstm_model_forward.6
= control target key start
LH: loop header
LB: loop body
LE: loop exit
PB: predicated region body
PF: predicated region fallthrough
CT: control target
= control target key end

     0   :  { %v1461_v1 = vmov 0   ;;  %v1462_v33 = vmov 0.0|0.0   ;;  %s2118_s1 = inlined_call_operand.vmem [shape: bf16[128,512], index: 1, kind: input, shape index: {}]   ;;  %s2119_s0 = inlined_call_operand.vmem [shape: f32[8,8,512], index: 0, kind: input, shape index: {}]   ;;  %s2120_s2 = inlined_call_operand.vmem [shape: f32[8,8,128], index: 2, kind: output, shape index: {}]  }
   0x1   :  { %v1481_v0 = vld [vmem:[%s2118_s1 + $0x4] ss:$16 sps:$4 sm:$0xff]   ;;  %249 = vmatprep.mubr.bf16.mxu0 %v1461_v1  ;;  %290 = vmatprep.mubr.bf16.mxu1 %v1461_v1  ;;  %v1488_v2 = vld [vmem:[%s2118_s1] ss:$16 sps:$4 sm:$0xff]   ;;  %v1511_v6 = vld [vmem:[%s2118_s1 + $0xc] ss:$16 sps:$4 sm:$0xff]  }
   0x2   :  { %217 = vmatprep.subr.bf16.mxu0 %v1481_v0  ;;  %v1494_v3 = vld [vmem:[%s2118_s1 + $0x24] ss:$16 sps:$4 sm:$0xff]   ;;  %v1500_v4 = vld [vmem:[%s2118_s1 + $0x20] ss:$16 sps:$4 sm:$0xff]   ;;  %v1516_v7 = vld [vmem:[%s2118_s1 + $0x8] ss:$16 sps:$4 sm:$0xff]   ;;  %258 = vmatprep.subr.bf16.mxu1 %v1511_v6 }
   0x3   :  { %218 = vmatpush1.bf16.msra.mxu0 %v1488_v2  ;;  %v1506_v5 = vld [vmem:[%s2118_s1 + $0x44] ss:$16 sps:$4 sm:$0xff]   ;;  %v1522_v8 = vld [vmem:[%s2118_s1 + $0x40] ss:$16 sps:$4 sm:$0xff]   ;;  %259 = vmatpush1.bf16.msra.mxu1 %v1516_v7  ;;  %v1535_v10 = vld [vmem:[%s2118_s1 + $0x2c] ss:$16 sps:$4 sm:$0xff]  }
   0x4   :  { %219 = vmatprep.subr.bf16.mxu0 %v1494_v3  ;;  %v1529_v9 = vld [vmem:[%s2118_s1 + $0x64] ss:$16 sps:$4 sm:$0xff]   ;;  %v1540_v11 = vld [vmem:[%s2118_s1 + $0x28] ss:$16 sps:$4 sm:$0xff]   ;;  %260 = vmatprep.subr.bf16.mxu1 %v1535_v10  ;;  %v1547_v12 = vld [vmem:[%s2118_s1 + $0x60] ss:$16 sps:$4 sm:$0xff]  }
   0x5   :  { %v1552_v13 = vld [vmem:[%s2118_s1 + $0x84] ss:$16 sps:$4 sm:$0xff]   ;;  %v1557_v14 = vld [vmem:[%s2118_s1 + $0x4c] ss:$16 sps:$4 sm:$0xff]   ;;  %v1564_v15 = vld [vmem:[%s2118_s1 + $0x48] ss:$16 sps:$4 sm:$0xff]  }
   0x6   :  { %v1570_v16 = vld [vmem:[%s2118_s1 + $0x6c] ss:$16 sps:$4 sm:$0xff]   ;;  %v1576_v17 = vld [vmem:[%s2118_s1 + $0x80] ss:$16 sps:$4 sm:$0xff]   ;;  %v1582_v18 = vld [vmem:[%s2118_s1 + $0xa4] ss:$16 sps:$4 sm:$0xff]  }
   0x7   :  { %220 = vmatpush1.bf16.msra.mxu0 %v1500_v4  ;;  %261 = vmatpush1.bf16.msra.mxu1 %v1540_v11  ;;  %v1588_v19 = vld [vmem:[%s2118_s1 + $0x68] ss:$16 sps:$4 sm:$0xff]   ;;  %v1594_v20 = vld [vmem:[%s2118_s1 + $0x8c] ss:$16 sps:$4 sm:$0xff]   ;;  %v1600_v21 = vld [vmem:[%s2118_s1 + $0xa0] ss:$16 sps:$4 sm:$0xff]  }
   0x8   :  { %221 = vmatprep.subr.bf16.mxu0 %v1506_v5  ;;  %262 = vmatprep.subr.bf16.mxu1 %v1557_v14  ;;  %v1605_v22 = vld [vmem:[%s2118_s1 + $0xc4] ss:$16 sps:$4 sm:$0xff]   ;;  %v1612_v23 = vld [vmem:[%s2118_s1 + $0x88] ss:$16 sps:$4 sm:$0xff]   ;;  %v1618_v24 = vld [vmem:[%s2118_s1 + $0xac] ss:$16 sps:$4 sm:$0xff]  }
   0x9   :  { %v1624_v25 = vld [vmem:[%s2118_s1 + $0xc0] ss:$16 sps:$4 sm:$0xff]   ;;  %v1630_v26 = vld [vmem:[%s2118_s1 + $0xe4] ss:$16 sps:$4 sm:$0xff]   ;;  %v1636_v27 = vld [vmem:[%s2118_s1 + $0xa8] ss:$16 sps:$4 sm:$0xff]  }
   0xa   :  { %v1642_v28 = vld [vmem:[%s2118_s1 + $0xcc] ss:$16 sps:$4 sm:$0xff]   ;;  %v1648_v29 = vld [vmem:[%s2118_s1 + $0xe0] ss:$16 sps:$4 sm:$0xff]   ;;  %v1655_v30 = vld [vmem:[%s2118_s1 + $0xc8] ss:$16 sps:$4 sm:$0xff]  }
   0xb   :  { %222 = vmatpush1.bf16.msra.mxu0 %v1522_v8  ;;  %263 = vmatpush1.bf16.msra.mxu1 %v1564_v15  ;;  %v1661_v31 = vld [vmem:[%s2118_s1 + $0xec] ss:$16 sps:$4 sm:$0xff]   ;;  %v1668_v32 = vld [vmem:[%s2118_s1 + $0xe8] ss:$16 sps:$4 sm:$0xff]   ;;  %v52_v34 = vld [vmem:[%s2119_s0] sm:$0xff] }
   0xc   :  { %223 = vmatprep.subr.bf16.mxu0 %v1529_v9  ;;  %264 = vmatprep.subr.bf16.mxu1 %v1570_v16  ;;  %v53_v35 = vld [vmem:[%s2119_s0 + $0x8] sm:$0xff]  ;;  %v55_v44 = vld [vmem:[%s2119_s0 + $0x18] sm:$0xff]  ;;  %v54_v50 = vld [vmem:[%s2119_s0 + $0x10] sm:$0xff] }
   0xf   :  { %224 = vmatpush1.bf16.msra.mxu0 %v1547_v12  ;;  %265 = vmatpush1.bf16.msra.mxu1 %v1588_v19 }
  0x10   :  { %225 = vmatprep.subr.bf16.mxu0 %v1552_v13  ;;  %266 = vmatprep.subr.bf16.mxu1 %v1594_v20 }
  0x13   :  { %226 = vmatpush1.bf16.msra.mxu0 %v1576_v17  ;;  %267 = vmatpush1.bf16.msra.mxu1 %v1612_v23 }
  0x14   :  { %227 = vmatprep.subr.bf16.mxu0 %v1582_v18  ;;  %268 = vmatprep.subr.bf16.mxu1 %v1618_v24 }
  0x17   :  { %228 = vmatpush1.bf16.msra.mxu0 %v1600_v21  ;;  %269 = vmatpush1.bf16.msra.mxu1 %v1636_v27 }
  0x18   :  { %229 = vmatprep.subr.bf16.mxu0 %v1605_v22  ;;  %270 = vmatprep.subr.bf16.mxu1 %v1642_v28 }
  0x1b   :  { %230 = vmatpush1.bf16.msra.mxu0 %v1624_v25  ;;  %271 = vmatpush1.bf16.msra.mxu1 %v1655_v30 }
  0x1c   :  { %231 = vmatprep.subr.bf16.mxu0 %v1630_v26  ;;  %272 = vmatprep.subr.bf16.mxu1 %v1661_v31 }
  0x1f   :  { %232 = vmatpush1.bf16.msra.mxu0 %v1648_v29  ;;  %273 = vmatpush1.bf16.msra.mxu1 %v1668_v32 }
  0x20   :  { %334 = vmatprep.subr.bf16.mxu0 %v1481_v0  ;;  %375 = vmatprep.subr.bf16.mxu1 %v1511_v6 }
  0x22   :  { %250 = vmatmul.mubr.bf16.vlgmr.msra.gmra.mrb[0].mxu0 %v1462_v33  ;;  %291 = vmatmul.mubr.bf16.vlgmr.msra.gmra.mrb[0].mxu1 %v1462_v33 }
  0x23   :  { %335 = vmatpush1.bf16.msra.mxu0 %v1488_v2  ;;  %366 = vmatprep.mubr.bf16.mxu0 %v1461_v1 }
  0x24   :  { %336 = vmatprep.subr.bf16.mxu0 %v1494_v3  ;;  %376 = vmatpush1.bf16.msra.mxu1 %v1516_v7 }
  0x25   :  { %377 = vmatprep.subr.bf16.mxu1 %v1535_v10  ;;  %407 = vmatprep.mubr.bf16.mxu1 %v1461_v1 }
  0x27   :  { %337 = vmatpush1.bf16.msra.mxu0 %v1500_v4 }
  0x28   :  { %338 = vmatprep.subr.bf16.mxu0 %v1506_v5  ;;  %378 = vmatpush1.bf16.msra.mxu1 %v1540_v11 }
  0x29   :  { %379 = vmatprep.subr.bf16.mxu1 %v1557_v14 }
  0x2b   :  { %339 = vmatpush1.bf16.msra.mxu0 %v1522_v8 }
  0x2c   :  { %340 = vmatprep.subr.bf16.mxu0 %v1529_v9  ;;  %380 = vmatpush1.bf16.msra.mxu1 %v1564_v15 }
  0x2d   :  { %381 = vmatprep.subr.bf16.mxu1 %v1570_v16 }
  0x2f   :  { %341 = vmatpush1.bf16.msra.mxu0 %v1547_v12 }
  0x30   :  { %342 = vmatprep.subr.bf16.mxu0 %v1552_v13  ;;  %382 = vmatpush1.bf16.msra.mxu1 %v1588_v19 }
  0x31   :  { %383 = vmatprep.subr.bf16.mxu1 %v1594_v20 }
  0x33   :  { %343 = vmatpush1.bf16.msra.mxu0 %v1576_v17 }
  0x34   :  { %344 = vmatprep.subr.bf16.mxu0 %v1582_v18  ;;  %384 = vmatpush1.bf16.msra.mxu1 %v1612_v23 }
  0x35   :  { %385 = vmatprep.subr.bf16.mxu1 %v1618_v24 }
  0x37   :  { %345 = vmatpush1.bf16.msra.mxu0 %v1600_v21 }
  0x38   :  { %346 = vmatprep.subr.bf16.mxu0 %v1605_v22  ;;  %386 = vmatpush1.bf16.msra.mxu1 %v1636_v27 }
  0x39   :  { %387 = vmatprep.subr.bf16.mxu1 %v1642_v28 }
  0x3b   :  { %347 = vmatpush1.bf16.msra.mxu0 %v1624_v25 }
  0x3c   :  { %348 = vmatprep.subr.bf16.mxu0 %v1630_v26  ;;  %388 = vmatpush1.bf16.msra.mxu1 %v1655_v30 }
  0x3d   :  { %389 = vmatprep.subr.bf16.mxu1 %v1661_v31 }
  0x3f   :  { %349 = vmatpush1.bf16.msra.mxu0 %v1648_v29 }
  0x40   :  { %452 = vmatprep.subr.bf16.mxu0 %v1481_v0  ;;  %390 = vmatpush1.bf16.msra.mxu1 %v1668_v32 }
  0x41   :  { %493 = vmatprep.subr.bf16.mxu1 %v1511_v6 }
  0xf5   :  { %v251_v36 = vpop.f32.mrb[0].mxu0  ;;  %v292_v45 = vpop.f32.mrb[0].mxu1 }
  0xf6   :  { %v299_v37 = vadd.f32 %v251_v36, %v52_v34  ;;  %v253_v38 = vpop.f32.mrb[1].mxu0  ;;  %v294_v46 = vpop.f32.mrb[1].mxu1  ;;  %v301_v52 = vadd.f32 %v292_v45, %v54_v50 }
  0xf7   :  { %v300_v39 = vadd.f32 %v253_v38, %v53_v35  ;;  %v255_v40 = vpop.f32.mrb[2].mxu0  ;;  %v302_v47 = vadd.f32 %v294_v46, %v55_v44  ;;  %v296_v48 = vpop.f32.mrb[2].mxu1  ;;  %v1195_v38 = vld [vmem:[%s2119_s0 + $0x20] sm:$0xff] }
  0xf8   :  { %v1192_v41 = vmul.f32 -1.442695, %v299_v37  ;;  %v256_v42 = vpop.f32.mrb[3].mxu0  ;;  %v297_v49 = vpop.f32.mrb[3].mxu1 }
  0xf9   :  { %v1193_v43 = vmul.f32 -1.442695, %v300_v39  ;;  %v1194_v51 = vmul.f32 -1.442695, %v302_v47  ;;  %v1196_v39 = vld [vmem:[%s2119_s0 + $0x28] sm:$0xff] }
  0xfa   :  { %1301 = vpow2.f32 %v1192_v41 }
  0xfb   :  { %1303 = vpow2.f32 %v1193_v43 }
  0xfc   :  { %1305 = vpow2.f32 %v1194_v51 }
  0xfd   :  { %1307 = vtanh.f32 %v301_v52  ;;  %v1198_v52 = vld [vmem:[%s2119_s0 + $0x38] sm:$0xff] }
 0x104   :  { %v1302_v53 = vpop.eup %1301 }
 0x105   :  { %v1304_v54 = vpop.eup %1303  ;;  %v306_v55 = vadd.f32 1.0, %v1302_v53 }
 0x106   :  { %v312_v56 = vadd.f32 1.0, %v1304_v54  ;;  %v1306_v57 = vpop.eup %1305  ;;  %v1197_v54 = vld [vmem:[%s2119_s0 + $0x30] sm:$0xff] }
 0x107   :  { %1309 = vrcp.f32 %v306_v55  ;;  %v1308_v58 = vpop.eup %1307  ;;  %v319_v60 = vadd.f32 1.0, %v1306_v57 }
 0x108   :  { %1311 = vrcp.f32 %v312_v56 }
 0x109   :  { %1313 = vrcp.f32 %v319_v60 }
 0x111   :  { %v1310_v59 = vpop.eup %1309 }
 0x112   :  { %v1312_v61 = vpop.eup %1311  ;;  %v323_v62 = vmul.f32 %v1310_v59, %v1308_v58 }
 0x113   :  { %v322_v63 = vmul.f32 0.0, %v1312_v61  ;;  %v1314_v34 = vpop.eup %1313 }
 0x115   :  { %v1720_v33 = vadd.f32 %v323_v62, %v322_v63 }
 0x117   :  { %1315 = vtanh.f32 %v1720_v33 }
 0x121   :  { %v1316_v35 = vpop.eup %1315 }
 0x122   :  { %v326_v36 = vmul.f32 %v1316_v35, %v1314_v34 }
 0x124   :  { %327 = vst [vmem:[%s2120_s2] sm:$0xff] %v326_v36  ;;  %v333_v37 = vpack.c.bf16 %v326_v36, %v326_v36 }
 0x126   :  { %367 = vmatmul.mubr.bf16.vlgmr.msra.gmra.mrb[4].mxu0 %v333_v37  ;;  %408 = vmatmul.mubr.bf16.vlgmr.msra.gmra.mrb[4].mxu1 %v333_v37 }
 0x127   :  { %453 = vmatpush1.bf16.msra.mxu0 %v1488_v2  ;;  %494 = vmatpush1.bf16.msra.mxu1 %v1516_v7 }
 0x128   :  { %454 = vmatprep.subr.bf16.mxu0 %v1494_v3  ;;  %495 = vmatprep.subr.bf16.mxu1 %v1535_v10 }
 0x129   :  { %484 = vmatprep.mubr.bf16.mxu0 %v1461_v1  ;;  %525 = vmatprep.mubr.bf16.mxu1 %v1461_v1 }
 0x12b   :  { %455 = vmatpush1.bf16.msra.mxu0 %v1500_v4  ;;  %496 = vmatpush1.bf16.msra.mxu1 %v1540_v11 }
 0x12c   :  { %456 = vmatprep.subr.bf16.mxu0 %v1506_v5  ;;  %497 = vmatprep.subr.bf16.mxu1 %v1557_v14 }
 0x12f   :  { %457 = vmatpush1.bf16.msra.mxu0 %v1522_v8  ;;  %498 = vmatpush1.bf16.msra.mxu1 %v1564_v15 }
 0x130   :  { %458 = vmatprep.subr.bf16.mxu0 %v1529_v9  ;;  %499 = vmatprep.subr.bf16.mxu1 %v1570_v16 }
 0x133   :  { %459 = vmatpush1.bf16.msra.mxu0 %v1547_v12  ;;  %500 = vmatpush1.bf16.msra.mxu1 %v1588_v19 }
 0x134   :  { %460 = vmatprep.subr.bf16.mxu0 %v1552_v13  ;;  %501 = vmatprep.subr.bf16.mxu1 %v1594_v20 }
 0x137   :  { %461 = vmatpush1.bf16.msra.mxu0 %v1576_v17  ;;  %502 = vmatpush1.bf16.msra.mxu1 %v1612_v23 }
 0x138   :  { %462 = vmatprep.subr.bf16.mxu0 %v1582_v18  ;;  %503 = vmatprep.subr.bf16.mxu1 %v1618_v24 }
 0x13b   :  { %463 = vmatpush1.bf16.msra.mxu0 %v1600_v21  ;;  %504 = vmatpush1.bf16.msra.mxu1 %v1636_v27 }
 0x13c   :  { %464 = vmatprep.subr.bf16.mxu0 %v1605_v22  ;;  %505 = vmatprep.subr.bf16.mxu1 %v1642_v28 }
 0x13f   :  { %465 = vmatpush1.bf16.msra.mxu0 %v1624_v25  ;;  %506 = vmatpush1.bf16.msra.mxu1 %v1655_v30 }
 0x140   :  { %466 = vmatprep.subr.bf16.mxu0 %v1630_v26  ;;  %507 = vmatprep.subr.bf16.mxu1 %v1661_v31 }
 0x143   :  { %467 = vmatpush1.bf16.msra.mxu0 %v1648_v29  ;;  %508 = vmatpush1.bf16.msra.mxu1 %v1668_v32 }
 0x144   :  { %570 = vmatprep.subr.bf16.mxu0 %v1481_v0  ;;  %611 = vmatprep.subr.bf16.mxu1 %v1511_v6 }
 0x1f9   :  { %v368_v40 = vpop.f32.mrb[4].mxu0  ;;  %v409_v41 = vpop.f32.mrb[4].mxu1 }
 0x1fa   :  { %v416_v42 = vadd.f32 %v1195_v38, %v368_v40  ;;  %v370_v43 = vpop.f32.mrb[5].mxu0  ;;  %v411_v44 = vpop.f32.mrb[5].mxu1  ;;  %v418_v56 = vadd.f32 %v1197_v54, %v409_v41 }
 0x1fb   :  { %v417_v45 = vadd.f32 %v1196_v39, %v370_v43  ;;  %v372_v46 = vpop.f32.mrb[6].mxu0  ;;  %v413_v47 = vpop.f32.mrb[6].mxu1  ;;  %v419_v53 = vadd.f32 %v1198_v52, %v411_v44  ;;  %v1204_v43 = vld [vmem:[%s2119_s0 + $0x48] sm:$0xff] }
 0x1fc   :  { %v1199_v48 = vmul.f32 -1.442695, %v416_v42  ;;  %v373_v49 = vpop.f32.mrb[7].mxu0  ;;  %v414_v50 = vpop.f32.mrb[7].mxu1 }
 0x1fd   :  { %v1200_v51 = vmul.f32 -1.442695, %v417_v45  ;;  %v1201_v55 = vmul.f32 -1.442695, %v419_v53 }
 0x1fe   :  { %1317 = vpow2.f32 %v1199_v48 }
 0x1ff   :  { %1319 = vpow2.f32 %v1200_v51 }
 0x200   :  { %1321 = vpow2.f32 %v1201_v55 }
 0x201   :  { %1323 = vtanh.f32 %v418_v56  ;;  %v1206_v56 = vld [vmem:[%s2119_s0 + $0x58] sm:$0xff] }
 0x208   :  { %v1318_v57 = vpop.eup %1317 }
 0x209   :  { %v1320_v58 = vpop.eup %1319  ;;  %v423_v59 = vadd.f32 1.0, %v1318_v57 }
 0x20a   :  { %v429_v60 = vadd.f32 1.0, %v1320_v58  ;;  %v1322_v61 = vpop.eup %1321  ;;  %v1205_v58 = vld [vmem:[%s2119_s0 + $0x50] sm:$0xff] }
 0x20b   :  { %1325 = vrcp.f32 %v423_v59  ;;  %v1324_v62 = vpop.eup %1323  ;;  %v436_v36 = vadd.f32 1.0, %v1322_v61 }
 0x20c   :  { %1327 = vrcp.f32 %v429_v60 }
 0x20d   :  { %1329 = vrcp.f32 %v436_v36 }
 0x215   :  { %v1326_v63 = vpop.eup %1325 }
 0x216   :  { %v1328_v34 = vpop.eup %1327  ;;  %v440_v35 = vmul.f32 %v1326_v63, %v1324_v62 }
 0x217   :  { %v439_v37 = vmul.f32 %v1328_v34, %v1720_v33  ;;  %v1330_v39 = vpop.eup %1329  ;;  %v1203_v33 = vld [vmem:[%s2119_s0 + $0x40] sm:$0xff] }
 0x219   :  { %v1773_v38 = vadd.f32 %v440_v35, %v439_v37 }
 0x21b   :  { %1331 = vtanh.f32 %v1773_v38 }
 0x225   :  { %v1332_v40 = vpop.eup %1331 }
 0x226   :  { %v443_v41 = vmul.f32 %v1332_v40, %v1330_v39 }
 0x228   :  { %1202 = vst [vmem:[%s2120_s2 + $0x8] sm:$0xff] %v443_v41  ;;  %v451_v42 = vpack.c.bf16 %v443_v41, %v443_v41 }
 0x22a   :  { %485 = vmatmul.mubr.bf16.vlgmr.msra.gmra.mrb[8].mxu0 %v451_v42  ;;  %526 = vmatmul.mubr.bf16.vlgmr.msra.gmra.mrb[8].mxu1 %v451_v42 }
 0x22b   :  { %571 = vmatpush1.bf16.msra.mxu0 %v1488_v2  ;;  %612 = vmatpush1.bf16.msra.mxu1 %v1516_v7 }
 0x22c   :  { %572 = vmatprep.subr.bf16.mxu0 %v1494_v3  ;;  %613 = vmatprep.subr.bf16.mxu1 %v1535_v10 }
 0x22d   :  { %602 = vmatprep.mubr.bf16.mxu0 %v1461_v1  ;;  %643 = vmatprep.mubr.bf16.mxu1 %v1461_v1 }
 0x22f   :  { %573 = vmatpush1.bf16.msra.mxu0 %v1500_v4  ;;  %614 = vmatpush1.bf16.msra.mxu1 %v1540_v11 }
 0x230   :  { %574 = vmatprep.subr.bf16.mxu0 %v1506_v5  ;;  %615 = vmatprep.subr.bf16.mxu1 %v1557_v14 }
 0x233   :  { %575 = vmatpush1.bf16.msra.mxu0 %v1522_v8  ;;  %616 = vmatpush1.bf16.msra.mxu1 %v1564_v15 }
 0x234   :  { %576 = vmatprep.subr.bf16.mxu0 %v1529_v9  ;;  %617 = vmatprep.subr.bf16.mxu1 %v1570_v16 }
 0x237   :  { %577 = vmatpush1.bf16.msra.mxu0 %v1547_v12  ;;  %618 = vmatpush1.bf16.msra.mxu1 %v1588_v19 }
 0x238   :  { %578 = vmatprep.subr.bf16.mxu0 %v1552_v13  ;;  %619 = vmatprep.subr.bf16.mxu1 %v1594_v20 }
 0x23b   :  { %579 = vmatpush1.bf16.msra.mxu0 %v1576_v17  ;;  %620 = vmatpush1.bf16.msra.mxu1 %v1612_v23 }
 0x23c   :  { %580 = vmatprep.subr.bf16.mxu0 %v1582_v18  ;;  %621 = vmatprep.subr.bf16.mxu1 %v1618_v24 }
 0x23f   :  { %581 = vmatpush1.bf16.msra.mxu0 %v1600_v21  ;;  %622 = vmatpush1.bf16.msra.mxu1 %v1636_v27 }
 0x240   :  { %582 = vmatprep.subr.bf16.mxu0 %v1605_v22  ;;  %623 = vmatprep.subr.bf16.mxu1 %v1642_v28 }
 0x243   :  { %583 = vmatpush1.bf16.msra.mxu0 %v1624_v25  ;;  %624 = vmatpush1.bf16.msra.mxu1 %v1655_v30 }
 0x244   :  { %584 = vmatprep.subr.bf16.mxu0 %v1630_v26  ;;  %625 = vmatprep.subr.bf16.mxu1 %v1661_v31 }
 0x247   :  { %585 = vmatpush1.bf16.msra.mxu0 %v1648_v29  ;;  %626 = vmatpush1.bf16.msra.mxu1 %v1668_v32 }
 0x248   :  { %688 = vmatprep.subr.bf16.mxu0 %v1481_v0  ;;  %729 = vmatprep.subr.bf16.mxu1 %v1511_v6 }
 0x2fd   :  { %v486_v44 = vpop.f32.mrb[8].mxu0  ;;  %v527_v45 = vpop.f32.mrb[8].mxu1 }
 0x2fe   :  { %v534_v46 = vadd.f32 %v1203_v33, %v486_v44  ;;  %v488_v47 = vpop.f32.mrb[9].mxu0  ;;  %v529_v48 = vpop.f32.mrb[9].mxu1  ;;  %v536_v60 = vadd.f32 %v1205_v58, %v527_v45 }
 0x2ff   :  { %v535_v49 = vadd.f32 %v1204_v43, %v488_v47  ;;  %v490_v50 = vpop.f32.mrb[10].mxu0  ;;  %v531_v51 = vpop.f32.mrb[10].mxu1  ;;  %v537_v57 = vadd.f32 %v1206_v56, %v529_v48  ;;  %v1212_v47 = vld [vmem:[%s2119_s0 + $0x68] sm:$0xff] }
 0x300   :  { %v1207_v52 = vmul.f32 -1.442695, %v534_v46  ;;  %v491_v53 = vpop.f32.mrb[11].mxu0  ;;  %v532_v54 = vpop.f32.mrb[11].mxu1 }
 0x301   :  { %v1208_v55 = vmul.f32 -1.442695, %v535_v49  ;;  %v1209_v59 = vmul.f32 -1.442695, %v537_v57 }
 0x302   :  { %1333 = vpow2.f32 %v1207_v52 }
 0x303   :  { %1335 = vpow2.f32 %v1208_v55 }
 0x304   :  { %1337 = vpow2.f32 %v1209_v59 }
 0x305   :  { %1339 = vtanh.f32 %v536_v60  ;;  %v1214_v60 = vld [vmem:[%s2119_s0 + $0x78] sm:$0xff] }
 0x30c   :  { %v1334_v61 = vpop.eup %1333 }
 0x30d   :  { %v1336_v62 = vpop.eup %1335  ;;  %v541_v63 = vadd.f32 1.0, %v1334_v61 }
 0x30e   :  { %v547_v34 = vadd.f32 1.0, %v1336_v62  ;;  %v1338_v35 = vpop.eup %1337  ;;  %v1213_v62 = vld [vmem:[%s2119_s0 + $0x70] sm:$0xff] }
 0x30f   :  { %1341 = vrcp.f32 %v541_v63  ;;  %v1340_v36 = vpop.eup %1339  ;;  %v554_v41 = vadd.f32 1.0, %v1338_v35 }
 0x310   :  { %1343 = vrcp.f32 %v547_v34 }
 0x311   :  { %1345 = vrcp.f32 %v554_v41 }
 0x319   :  { %v1342_v37 = vpop.eup %1341 }
 0x31a   :  { %v1344_v39 = vpop.eup %1343  ;;  %v558_v40 = vmul.f32 %v1342_v37, %v1340_v36 }
 0x31b   :  { %v557_v42 = vmul.f32 %v1344_v39, %v1773_v38  ;;  %v1346_v43 = vpop.eup %1345  ;;  %v1211_v38 = vld [vmem:[%s2119_s0 + $0x60] sm:$0xff] }
 0x31d   :  { %v1826_v33 = vadd.f32 %v558_v40, %v557_v42 }
 0x31f   :  { %1347 = vtanh.f32 %v1826_v33 }
 0x329   :  { %v1348_v44 = vpop.eup %1347 }
 0x32a   :  { %v561_v45 = vmul.f32 %v1348_v44, %v1346_v43 }
 0x32c   :  { %1210 = vst [vmem:[%s2120_s2 + $0x10] sm:$0xff] %v561_v45  ;;  %v569_v46 = vpack.c.bf16 %v561_v45, %v561_v45 }
 0x32e   :  { %603 = vmatmul.mubr.bf16.vlgmr.msra.gmra.mrb[12].mxu0 %v569_v46  ;;  %644 = vmatmul.mubr.bf16.vlgmr.msra.gmra.mrb[12].mxu1 %v569_v46 }
 0x32f   :  { %689 = vmatpush1.bf16.msra.mxu0 %v1488_v2  ;;  %730 = vmatpush1.bf16.msra.mxu1 %v1516_v7 }
 0x330   :  { %690 = vmatprep.subr.bf16.mxu0 %v1494_v3  ;;  %731 = vmatprep.subr.bf16.mxu1 %v1535_v10 }
 0x331   :  { %720 = vmatprep.mubr.bf16.mxu0 %v1461_v1  ;;  %761 = vmatprep.mubr.bf16.mxu1 %v1461_v1 }
 0x333   :  { %691 = vmatpush1.bf16.msra.mxu0 %v1500_v4  ;;  %732 = vmatpush1.bf16.msra.mxu1 %v1540_v11 }
 0x334   :  { %692 = vmatprep.subr.bf16.mxu0 %v1506_v5  ;;  %733 = vmatprep.subr.bf16.mxu1 %v1557_v14 }
 0x337   :  { %693 = vmatpush1.bf16.msra.mxu0 %v1522_v8  ;;  %734 = vmatpush1.bf16.msra.mxu1 %v1564_v15 }
 0x338   :  { %694 = vmatprep.subr.bf16.mxu0 %v1529_v9  ;;  %735 = vmatprep.subr.bf16.mxu1 %v1570_v16 }
 0x33b   :  { %695 = vmatpush1.bf16.msra.mxu0 %v1547_v12  ;;  %736 = vmatpush1.bf16.msra.mxu1 %v1588_v19 }
 0x33c   :  { %696 = vmatprep.subr.bf16.mxu0 %v1552_v13  ;;  %737 = vmatprep.subr.bf16.mxu1 %v1594_v20 }
 0x33f   :  { %697 = vmatpush1.bf16.msra.mxu0 %v1576_v17  ;;  %738 = vmatpush1.bf16.msra.mxu1 %v1612_v23 }
 0x340   :  { %698 = vmatprep.subr.bf16.mxu0 %v1582_v18  ;;  %739 = vmatprep.subr.bf16.mxu1 %v1618_v24 }
 0x343   :  { %699 = vmatpush1.bf16.msra.mxu0 %v1600_v21  ;;  %740 = vmatpush1.bf16.msra.mxu1 %v1636_v27 }
 0x344   :  { %700 = vmatprep.subr.bf16.mxu0 %v1605_v22  ;;  %741 = vmatprep.subr.bf16.mxu1 %v1642_v28 }
 0x347   :  { %701 = vmatpush1.bf16.msra.mxu0 %v1624_v25  ;;  %742 = vmatpush1.bf16.msra.mxu1 %v1655_v30 }
 0x348   :  { %702 = vmatprep.subr.bf16.mxu0 %v1630_v26  ;;  %743 = vmatprep.subr.bf16.mxu1 %v1661_v31 }
 0x34b   :  { %703 = vmatpush1.bf16.msra.mxu0 %v1648_v29  ;;  %744 = vmatpush1.bf16.msra.mxu1 %v1668_v32 }
 0x34c   :  { %806 = vmatprep.subr.bf16.mxu0 %v1481_v0  ;;  %847 = vmatprep.subr.bf16.mxu1 %v1511_v6 }
 0x401   :  { %v604_v48 = vpop.f32.mrb[12].mxu0  ;;  %v645_v49 = vpop.f32.mrb[12].mxu1 }
 0x402   :  { %v652_v50 = vadd.f32 %v1211_v38, %v604_v48  ;;  %v606_v51 = vpop.f32.mrb[13].mxu0  ;;  %v647_v52 = vpop.f32.mrb[13].mxu1  ;;  %v654_v34 = vadd.f32 %v1213_v62, %v645_v49  ;;  %v1222_v62 = vld [vmem:[%s2119_s0 + $0x98] sm:$0xff] }
 0x403   :  { %v653_v53 = vadd.f32 %v1212_v47, %v606_v51  ;;  %v608_v54 = vpop.f32.mrb[14].mxu0  ;;  %v649_v55 = vpop.f32.mrb[14].mxu1  ;;  %v655_v61 = vadd.f32 %v1214_v60, %v647_v52  ;;  %v1220_v51 = vld [vmem:[%s2119_s0 + $0x88] sm:$0xff] }
 0x404   :  { %v1215_v56 = vmul.f32 -1.442695, %v652_v50  ;;  %v609_v57 = vpop.f32.mrb[15].mxu0  ;;  %v650_v58 = vpop.f32.mrb[15].mxu1 }
 0x405   :  { %v1216_v59 = vmul.f32 -1.442695, %v653_v53  ;;  %v1217_v63 = vmul.f32 -1.442695, %v655_v61 }
 0x406   :  { %1349 = vpow2.f32 %v1215_v56 }
 0x407   :  { %1351 = vpow2.f32 %v1216_v59 }
 0x408   :  { %1353 = vpow2.f32 %v1217_v63 }
 0x409   :  { %1355 = vtanh.f32 %v654_v34  ;;  %v1221_v34 = vld [vmem:[%s2119_s0 + $0x90] sm:$0xff] }
 0x410   :  { %v1350_v35 = vpop.eup %1349 }
 0x411   :  { %v1352_v36 = vpop.eup %1351  ;;  %v659_v37 = vadd.f32 1.0, %v1350_v35 }
 0x412   :  { %v665_v39 = vadd.f32 1.0, %v1352_v36  ;;  %v1354_v40 = vpop.eup %1353 }
 0x413   :  { %1357 = vrcp.f32 %v659_v37  ;;  %v1356_v41 = vpop.eup %1355  ;;  %v672_v45 = vadd.f32 1.0, %v1354_v40 }
 0x414   :  { %1359 = vrcp.f32 %v665_v39 }
 0x415   :  { %1361 = vrcp.f32 %v672_v45 }
 0x41d   :  { %v1358_v42 = vpop.eup %1357 }
 0x41e   :  { %v1360_v43 = vpop.eup %1359  ;;  %v676_v44 = vmul.f32 %v1358_v42, %v1356_v41 }
 0x41f   :  { %v675_v46 = vmul.f32 %v1360_v43, %v1826_v33  ;;  %v1362_v47 = vpop.eup %1361  ;;  %v1219_v33 = vld [vmem:[%s2119_s0 + $0x80] sm:$0xff] }
 0x421   :  { %v1879_v38 = vadd.f32 %v676_v44, %v675_v46 }
 0x423   :  { %1363 = vtanh.f32 %v1879_v38 }
 0x42d   :  { %v1364_v48 = vpop.eup %1363 }
 0x42e   :  { %v679_v49 = vmul.f32 %v1364_v48, %v1362_v47 }
 0x430   :  { %1218 = vst [vmem:[%s2120_s2 + $0x18] sm:$0xff] %v679_v49  ;;  %v687_v50 = vpack.c.bf16 %v679_v49, %v679_v49 }
 0x432   :  { %721 = vmatmul.mubr.bf16.vlgmr.msra.gmra.mrb[16].mxu0 %v687_v50  ;;  %762 = vmatmul.mubr.bf16.vlgmr.msra.gmra.mrb[16].mxu1 %v687_v50 }
 0x433   :  { %807 = vmatpush1.bf16.msra.mxu0 %v1488_v2  ;;  %848 = vmatpush1.bf16.msra.mxu1 %v1516_v7 }
 0x434   :  { %808 = vmatprep.subr.bf16.mxu0 %v1494_v3  ;;  %849 = vmatprep.subr.bf16.mxu1 %v1535_v10 }
 0x435   :  { %838 = vmatprep.mubr.bf16.mxu0 %v1461_v1  ;;  %879 = vmatprep.mubr.bf16.mxu1 %v1461_v1 }
 0x437   :  { %809 = vmatpush1.bf16.msra.mxu0 %v1500_v4  ;;  %850 = vmatpush1.bf16.msra.mxu1 %v1540_v11 }
 0x438   :  { %810 = vmatprep.subr.bf16.mxu0 %v1506_v5  ;;  %851 = vmatprep.subr.bf16.mxu1 %v1557_v14 }
 0x43b   :  { %811 = vmatpush1.bf16.msra.mxu0 %v1522_v8  ;;  %852 = vmatpush1.bf16.msra.mxu1 %v1564_v15 }
 0x43c   :  { %812 = vmatprep.subr.bf16.mxu0 %v1529_v9  ;;  %853 = vmatprep.subr.bf16.mxu1 %v1570_v16 }
 0x43f   :  { %813 = vmatpush1.bf16.msra.mxu0 %v1547_v12  ;;  %854 = vmatpush1.bf16.msra.mxu1 %v1588_v19 }
 0x440   :  { %814 = vmatprep.subr.bf16.mxu0 %v1552_v13  ;;  %855 = vmatprep.subr.bf16.mxu1 %v1594_v20 }
 0x443   :  { %815 = vmatpush1.bf16.msra.mxu0 %v1576_v17  ;;  %856 = vmatpush1.bf16.msra.mxu1 %v1612_v23 }
 0x444   :  { %816 = vmatprep.subr.bf16.mxu0 %v1582_v18  ;;  %857 = vmatprep.subr.bf16.mxu1 %v1618_v24 }
 0x447   :  { %817 = vmatpush1.bf16.msra.mxu0 %v1600_v21  ;;  %858 = vmatpush1.bf16.msra.mxu1 %v1636_v27 }
 0x448   :  { %818 = vmatprep.subr.bf16.mxu0 %v1605_v22  ;;  %859 = vmatprep.subr.bf16.mxu1 %v1642_v28 }
 0x44b   :  { %819 = vmatpush1.bf16.msra.mxu0 %v1624_v25  ;;  %860 = vmatpush1.bf16.msra.mxu1 %v1655_v30 }
 0x44c   :  { %820 = vmatprep.subr.bf16.mxu0 %v1630_v26  ;;  %861 = vmatprep.subr.bf16.mxu1 %v1661_v31 }
 0x44f   :  { %821 = vmatpush1.bf16.msra.mxu0 %v1648_v29  ;;  %862 = vmatpush1.bf16.msra.mxu1 %v1668_v32 }
 0x450   :  { %924 = vmatprep.subr.bf16.mxu0 %v1481_v0  ;;  %965 = vmatprep.subr.bf16.mxu1 %v1511_v6 }
 0x505   :  { %v722_v52 = vpop.f32.mrb[16].mxu0  ;;  %v763_v53 = vpop.f32.mrb[16].mxu1 }
 0x506   :  { %v770_v54 = vadd.f32 %v1219_v33, %v722_v52  ;;  %v724_v55 = vpop.f32.mrb[17].mxu0  ;;  %v765_v56 = vpop.f32.mrb[17].mxu1  ;;  %v772_v36 = vadd.f32 %v1221_v34, %v763_v53  ;;  %v1438_v34 = vld [vmem:[%s2118_s1 + $0x4c] ss:$16 sps:$4 sm:$0xff]  }
 0x507   :  { %v771_v57 = vadd.f32 %v1220_v51, %v724_v55  ;;  %v726_v58 = vpop.f32.mrb[18].mxu0  ;;  %v767_v59 = vpop.f32.mrb[18].mxu1  ;;  %v773_v63 = vadd.f32 %v1222_v62, %v765_v56  ;;  %v1436_v62 = vld [vmem:[%s2118_s1 + $0x28] ss:$16 sps:$4 sm:$0xff]  }
 0x508   :  { %v1223_v60 = vmul.f32 -1.442695, %v770_v54  ;;  %v727_v0 = vpop.f32.mrb[19].mxu0  ;;  %v768_v61 = vpop.f32.mrb[19].mxu1  ;;  %v1431_v59 = vld [vmem:[%s2118_s1] ss:$16 sps:$4 sm:$0xff]  }
 0x509   :  { %v1224_v6 = vmul.f32 -1.442695, %v771_v57  ;;  %v1225_v35 = vmul.f32 -1.442695, %v773_v63  ;;  %v1433_v0 = vld [vmem:[%s2118_s1 + $0x24] ss:$16 sps:$4 sm:$0xff]  }
 0x50a   :  { %1365 = vpow2.f32 %v1223_v60  ;;  %v1432_v60 = vld [vmem:[%s2118_s1 + $0x8] ss:$16 sps:$4 sm:$0xff]   ;;  %v1434_v61 = vld [vmem:[%s2118_s1 + $0x2c] ss:$16 sps:$4 sm:$0xff]   ;;  %v1437_v63 = vld [vmem:[%s2118_s1 + $0x44] ss:$16 sps:$4 sm:$0xff]  }
 0x50b   :  { %1367 = vpow2.f32 %v1224_v6  ;;  %v1435_v6 = vld [vmem:[%s2118_s1 + $0x20] ss:$16 sps:$4 sm:$0xff]  }
 0x50c   :  { %1369 = vpow2.f32 %v1225_v35  ;;  %v1440_v35 = vld [vmem:[%s2118_s1 + $0x48] ss:$16 sps:$4 sm:$0xff]  }
 0x50d   :  { %1371 = vtanh.f32 %v772_v36  ;;  %v1441_v36 = vld [vmem:[%s2118_s1 + $0x64] ss:$16 sps:$4 sm:$0xff]  }
 0x514   :  { %v1366_v37 = vpop.eup %1365 }
 0x515   :  { %v1368_v39 = vpop.eup %1367  ;;  %v777_v40 = vadd.f32 1.0, %v1366_v37  ;;  %v1442_v37 = vld [vmem:[%s2118_s1 + $0x6c] ss:$16 sps:$4 sm:$0xff]  }
 0x516   :  { %v783_v41 = vadd.f32 1.0, %v1368_v39  ;;  %v1370_v42 = vpop.eup %1369  ;;  %v1443_v39 = vld [vmem:[%s2118_s1 + $0x60] ss:$16 sps:$4 sm:$0xff]  }
 0x517   :  { %1373 = vrcp.f32 %v777_v40  ;;  %v1372_v43 = vpop.eup %1371  ;;  %v790_v47 = vadd.f32 1.0, %v1370_v42  ;;  %v1444_v40 = vld [vmem:[%s2118_s1 + $0x68] ss:$16 sps:$4 sm:$0xff]   ;;  %v1446_v42 = vld [vmem:[%s2118_s1 + $0x8c] ss:$16 sps:$4 sm:$0xff]  }
 0x518   :  { %1375 = vrcp.f32 %v783_v41  ;;  %v1445_v41 = vld [vmem:[%s2118_s1 + $0x84] ss:$16 sps:$4 sm:$0xff]  }
 0x519   :  { %1377 = vrcp.f32 %v790_v47  ;;  %v1451_v47 = vld [vmem:[%s2118_s1 + $0xa0] ss:$16 sps:$4 sm:$0xff]  }
 0x521   :  { %v1374_v44 = vpop.eup %1373 }
 0x522   :  { %v1376_v45 = vpop.eup %1375  ;;  %v794_v46 = vmul.f32 %v1374_v44, %v1372_v43  ;;  %v1447_v43 = vld [vmem:[%s2118_s1 + $0x80] ss:$16 sps:$4 sm:$0xff]   ;;  %v1448_v44 = vld [vmem:[%s2118_s1 + $0x88] ss:$16 sps:$4 sm:$0xff]  }
 0x523   :  { %v793_v48 = vmul.f32 %v1376_v45, %v1879_v38  ;;  %v1378_v50 = vpop.eup %1377  ;;  %v1449_v45 = vld [vmem:[%s2118_s1 + $0xa4] ss:$16 sps:$4 sm:$0xff]  }
 0x525   :  { %v1932_v49 = vadd.f32 %v794_v46, %v793_v48  ;;  %v1450_v46 = vld [vmem:[%s2118_s1 + $0xac] ss:$16 sps:$4 sm:$0xff]   ;;  %v1452_v48 = vld [vmem:[%s2118_s1 + $0xa8] ss:$16 sps:$4 sm:$0xff]  }
 0x527   :  { %1379 = vtanh.f32 %v1932_v49 }
 0x531   :  { %v1380_v33 = vpop.eup %1379 }
 0x532   :  { %v797_v51 = vmul.f32 %v1380_v33, %v1378_v50  ;;  %v1454_v50 = vld [vmem:[%s2118_s1 + $0xcc] ss:$16 sps:$4 sm:$0xff]   ;;  %v1455_v33 = vld [vmem:[%s2118_s1 + $0xc0] ss:$16 sps:$4 sm:$0xff]  }
 0x534   :  { %1226 = vst [vmem:[%s2120_s2 + $0x20] sm:$0xff] %v797_v51  ;;  %v805_v52 = vpack.c.bf16 %v797_v51, %v797_v51  ;;  %v1456_v51 = vld [vmem:[%s2118_s1 + $0xc8] ss:$16 sps:$4 sm:$0xff]  }
 0x536   :  { %839 = vmatmul.mubr.bf16.vlgmr.msra.gmra.mrb[20].mxu0 %v805_v52  ;;  %880 = vmatmul.mubr.bf16.vlgmr.msra.gmra.mrb[20].mxu1 %v805_v52  ;;  %v1457_v52 = vld [vmem:[%s2118_s1 + $0xe4] ss:$16 sps:$4 sm:$0xff]  }
 0x537   :  { %925 = vmatpush1.bf16.msra.mxu0 %v1488_v2  ;;  %966 = vmatpush1.bf16.msra.mxu1 %v1516_v7  ;;  %v1429_v2 = vld [vmem:[%s2118_s1 + $0x4] ss:$16 sps:$4 sm:$0xff]  }
 0x538   :  { %926 = vmatprep.subr.bf16.mxu0 %v1494_v3  ;;  %967 = vmatprep.subr.bf16.mxu1 %v1535_v10  ;;  %v1430_v3 = vld [vmem:[%s2118_s1 + $0xc] ss:$16 sps:$4 sm:$0xff]  }
 0x539   :  { %956 = vmatprep.mubr.bf16.mxu0 %v1461_v1  ;;  %997 = vmatprep.mubr.bf16.mxu1 %v1461_v1 }
 0x53b   :  { %927 = vmatpush1.bf16.msra.mxu0 %v1500_v4  ;;  %968 = vmatpush1.bf16.msra.mxu1 %v1540_v11  ;;  %v1227_v4 = vld [vmem:[%s2119_s0 + $0xa0] sm:$0xff] }
 0x53c   :  { %928 = vmatprep.subr.bf16.mxu0 %v1506_v5  ;;  %969 = vmatprep.subr.bf16.mxu1 %v1557_v14  ;;  %v1228_v5 = vld [vmem:[%s2119_s0 + $0xa8] sm:$0xff] }
 0x53f   :  { %929 = vmatpush1.bf16.msra.mxu0 %v1522_v8  ;;  %970 = vmatpush1.bf16.msra.mxu1 %v1564_v15 }
 0x540   :  { %930 = vmatprep.subr.bf16.mxu0 %v1529_v9  ;;  %971 = vmatprep.subr.bf16.mxu1 %v1570_v16 }
 0x543   :  { %931 = vmatpush1.bf16.msra.mxu0 %v1547_v12  ;;  %972 = vmatpush1.bf16.msra.mxu1 %v1588_v19  ;;  %v1230_v19 = vld [vmem:[%s2119_s0 + $0xb8] sm:$0xff] }
 0x544   :  { %932 = vmatprep.subr.bf16.mxu0 %v1552_v13  ;;  %973 = vmatprep.subr.bf16.mxu1 %v1594_v20 }
 0x547   :  { %933 = vmatpush1.bf16.msra.mxu0 %v1576_v17  ;;  %974 = vmatpush1.bf16.msra.mxu1 %v1612_v23 }
 0x548   :  { %934 = vmatprep.subr.bf16.mxu0 %v1582_v18  ;;  %975 = vmatprep.subr.bf16.mxu1 %v1618_v24 }
 0x54b   :  { %935 = vmatpush1.bf16.msra.mxu0 %v1600_v21  ;;  %976 = vmatpush1.bf16.msra.mxu1 %v1636_v27  ;;  %v1229_v21 = vld [vmem:[%s2119_s0 + $0xb0] sm:$0xff] }
 0x54c   :  { %936 = vmatprep.subr.bf16.mxu0 %v1605_v22  ;;  %977 = vmatprep.subr.bf16.mxu1 %v1642_v28 }
 0x54f   :  { %937 = vmatpush1.bf16.msra.mxu0 %v1624_v25  ;;  %978 = vmatpush1.bf16.msra.mxu1 %v1655_v30 }
 0x550   :  { %938 = vmatprep.subr.bf16.mxu0 %v1630_v26  ;;  %979 = vmatprep.subr.bf16.mxu1 %v1661_v31 }
 0x553   :  { %939 = vmatpush1.bf16.msra.mxu0 %v1648_v29  ;;  %980 = vmatpush1.bf16.msra.mxu1 %v1668_v32 }
 0x554   :  { %1042 = vmatprep.subr.bf16.mxu0 %v1429_v2  ;;  %1083 = vmatprep.subr.bf16.mxu1 %v1430_v3  ;;  %v1458_v2 = vld [vmem:[%s2118_s1 + $0xec] ss:$16 sps:$4 sm:$0xff]   ;;  %v1459_v3 = vld [vmem:[%s2118_s1 + $0xe0] ss:$16 sps:$4 sm:$0xff]  }
 0x609   :  { %v840_v7 = vpop.f32.mrb[20].mxu0  ;;  %v881_v8 = vpop.f32.mrb[20].mxu1 }
 0x60a   :  { %v888_v9 = vadd.f32 %v1227_v4, %v840_v7  ;;  %v842_v10 = vpop.f32.mrb[21].mxu0  ;;  %v883_v11 = vpop.f32.mrb[21].mxu1  ;;  %v890_v23 = vadd.f32 %v1229_v21, %v881_v8  ;;  %v1460_v4 = vld [vmem:[%s2118_s1 + $0xe8] ss:$16 sps:$4 sm:$0xff]  }
 0x60b   :  { %v889_v12 = vadd.f32 %v1228_v5, %v842_v10  ;;  %v844_v13 = vpop.f32.mrb[22].mxu0  ;;  %v885_v14 = vpop.f32.mrb[22].mxu1  ;;  %v891_v20 = vadd.f32 %v1230_v19, %v883_v11  ;;  %v1235_v5 = vld [vmem:[%s2119_s0 + $0xc0] sm:$0xff]  ;;  %v1236_v7 = vld [vmem:[%s2119_s0 + $0xc8] sm:$0xff] }
 0x60c   :  { %v1231_v15 = vmul.f32 -1.442695, %v888_v9  ;;  %v845_v16 = vpop.f32.mrb[23].mxu0  ;;  %v886_v17 = vpop.f32.mrb[23].mxu1 }
 0x60d   :  { %v1232_v18 = vmul.f32 -1.442695, %v889_v12  ;;  %v1233_v22 = vmul.f32 -1.442695, %v891_v20  ;;  %v1238_v20 = vld [vmem:[%s2119_s0 + $0xd8] sm:$0xff] }
 0x60e   :  { %1381 = vpow2.f32 %v1231_v15 }
 0x60f   :  { %1383 = vpow2.f32 %v1232_v18 }
 0x610   :  { %1385 = vpow2.f32 %v1233_v22  ;;  %v1237_v22 = vld [vmem:[%s2119_s0 + $0xd0] sm:$0xff] }
 0x611   :  { %1387 = vtanh.f32 %v890_v23 }
 0x618   :  { %v1382_v24 = vpop.eup %1381 }
 0x619   :  { %v1384_v25 = vpop.eup %1383  ;;  %v895_v26 = vadd.f32 1.0, %v1382_v24 }
 0x61a   :  { %v901_v27 = vadd.f32 1.0, %v1384_v25  ;;  %v1386_v28 = vpop.eup %1385 }
 0x61b   :  { %1389 = vrcp.f32 %v895_v26  ;;  %v1388_v29 = vpop.eup %1387  ;;  %v908_v38 = vadd.f32 1.0, %v1386_v28 }
 0x61c   :  { %1391 = vrcp.f32 %v901_v27 }
 0x61d   :  { %1393 = vrcp.f32 %v908_v38 }
 0x625   :  { %v1390_v30 = vpop.eup %1389 }
 0x626   :  { %v1392_v31 = vpop.eup %1391  ;;  %v912_v32 = vmul.f32 %v1390_v30, %v1388_v29 }
 0x627   :  { %v911_v53 = vmul.f32 %v1392_v31, %v1932_v49  ;;  %v1394_v55 = vpop.eup %1393  ;;  %v1453_v49 = vld [vmem:[%s2118_s1 + $0xc4] ss:$16 sps:$4 sm:$0xff]  }
 0x629   :  { %v1989_v54 = vadd.f32 %v912_v32, %v911_v53 }
 0x62b   :  { %1395 = vtanh.f32 %v1989_v54 }
 0x635   :  { %v1396_v56 = vpop.eup %1395 }
 0x636   :  { %v915_v57 = vmul.f32 %v1396_v56, %v1394_v55 }
 0x638   :  { %1234 = vst [vmem:[%s2120_s2 + $0x28] sm:$0xff] %v915_v57  ;;  %v923_v58 = vpack.c.bf16 %v915_v57, %v915_v57 }
 0x63a   :  { %957 = vmatmul.mubr.bf16.vlgmr.msra.gmra.mrb[24].mxu0 %v923_v58  ;;  %998 = vmatmul.mubr.bf16.vlgmr.msra.gmra.mrb[24].mxu1 %v923_v58 }
 0x63b   :  { %1043 = vmatpush1.bf16.msra.mxu0 %v1431_v59  ;;  %1084 = vmatpush1.bf16.msra.mxu1 %v1432_v60 }
 0x63c   :  { %1044 = vmatprep.subr.bf16.mxu0 %v1433_v0  ;;  %1085 = vmatprep.subr.bf16.mxu1 %v1434_v61  ;;  %v1243_v0 = vld [vmem:[%s2119_s0 + $0xe0] sm:$0xff] }
 0x63d   :  { %1074 = vmatprep.mubr.bf16.mxu0 %v1461_v1  ;;  %1115 = vmatprep.mubr.bf16.mxu1 %v1461_v1  ;;  %v1439_v1 = vld [vmem:[%s2118_s1 + $0x40] ss:$16 sps:$4 sm:$0xff]  }
 0x63f   :  { %1045 = vmatpush1.bf16.msra.mxu0 %v1435_v6  ;;  %1086 = vmatpush1.bf16.msra.mxu1 %v1436_v62 }
 0x640   :  { %1046 = vmatprep.subr.bf16.mxu0 %v1437_v63  ;;  %1087 = vmatprep.subr.bf16.mxu1 %v1438_v34 }
 0x643   :  { %1047 = vmatpush1.bf16.msra.mxu0 %v1439_v1  ;;  %1088 = vmatpush1.bf16.msra.mxu1 %v1440_v35 }
 0x644   :  { %1048 = vmatprep.subr.bf16.mxu0 %v1441_v36  ;;  %1089 = vmatprep.subr.bf16.mxu1 %v1442_v37 }
 0x647   :  { %1049 = vmatpush1.bf16.msra.mxu0 %v1443_v39  ;;  %1090 = vmatpush1.bf16.msra.mxu1 %v1444_v40 }
 0x648   :  { %1050 = vmatprep.subr.bf16.mxu0 %v1445_v41  ;;  %1091 = vmatprep.subr.bf16.mxu1 %v1446_v42  ;;  %v1246_v42 = vld [vmem:[%s2119_s0 + $0xf8] sm:$0xff] }
 0x64b   :  { %1051 = vmatpush1.bf16.msra.mxu0 %v1447_v43  ;;  %1092 = vmatpush1.bf16.msra.mxu1 %v1448_v44  ;;  %v1245_v44 = vld [vmem:[%s2119_s0 + $0xf0] sm:$0xff] }
 0x64c   :  { %1052 = vmatprep.subr.bf16.mxu0 %v1449_v45  ;;  %1093 = vmatprep.subr.bf16.mxu1 %v1450_v46 }
 0x64f   :  { %1053 = vmatpush1.bf16.msra.mxu0 %v1451_v47  ;;  %1094 = vmatpush1.bf16.msra.mxu1 %v1452_v48 }
 0x650   :  { %1054 = vmatprep.subr.bf16.mxu0 %v1453_v49  ;;  %1095 = vmatprep.subr.bf16.mxu1 %v1454_v50 }
 0x653   :  { %1055 = vmatpush1.bf16.msra.mxu0 %v1455_v33  ;;  %1096 = vmatpush1.bf16.msra.mxu1 %v1456_v51 }
 0x654   :  { %1056 = vmatprep.subr.bf16.mxu0 %v1457_v52  ;;  %1097 = vmatprep.subr.bf16.mxu1 %v1458_v2 }
 0x657   :  { %1057 = vmatpush1.bf16.msra.mxu0 %v1459_v3  ;;  %1098 = vmatpush1.bf16.msra.mxu1 %v1460_v4 }
 0x70d   :  { %v958_v8 = vpop.f32.mrb[24].mxu0  ;;  %v999_v9 = vpop.f32.mrb[24].mxu1 }
 0x70e   :  { %v1006_v10 = vadd.f32 %v1235_v5, %v958_v8  ;;  %v960_v11 = vpop.f32.mrb[25].mxu0  ;;  %v1001_v12 = vpop.f32.mrb[25].mxu1  ;;  %v1008_v24 = vadd.f32 %v1237_v22, %v999_v9 }
 0x70f   :  { %v1007_v13 = vadd.f32 %v1236_v7, %v960_v11  ;;  %v962_v14 = vpop.f32.mrb[26].mxu0  ;;  %v1003_v15 = vpop.f32.mrb[26].mxu1  ;;  %v1009_v21 = vadd.f32 %v1238_v20, %v1001_v12 }
 0x710   :  { %v1239_v16 = vmul.f32 -1.442695, %v1006_v10  ;;  %v963_v17 = vpop.f32.mrb[27].mxu0  ;;  %v1004_v18 = vpop.f32.mrb[27].mxu1 }
 0x711   :  { %v1240_v19 = vmul.f32 -1.442695, %v1007_v13  ;;  %v1241_v23 = vmul.f32 -1.442695, %v1009_v21 }
 0x712   :  { %1397 = vpow2.f32 %v1239_v16 }
 0x713   :  { %1399 = vpow2.f32 %v1240_v19 }
 0x714   :  { %1401 = vpow2.f32 %v1241_v23 }
 0x715   :  { %1403 = vtanh.f32 %v1008_v24 }
 0x71c   :  { %v1398_v25 = vpop.eup %1397 }
 0x71d   :  { %v1400_v26 = vpop.eup %1399  ;;  %v1013_v27 = vadd.f32 1.0, %v1398_v25 }
 0x71e   :  { %v1019_v28 = vadd.f32 1.0, %v1400_v26  ;;  %v1402_v29 = vpop.eup %1401 }
 0x71f   :  { %1405 = vrcp.f32 %v1013_v27  ;;  %v1404_v30 = vpop.eup %1403  ;;  %v1026_v53 = vadd.f32 1.0, %v1402_v29 }
 0x720   :  { %1407 = vrcp.f32 %v1019_v28 }
 0x721   :  { %1409 = vrcp.f32 %v1026_v53 }
 0x729   :  { %v1406_v31 = vpop.eup %1405 }
 0x72a   :  { %v1408_v32 = vpop.eup %1407  ;;  %v1030_v38 = vmul.f32 %v1406_v31, %v1404_v30 }
 0x72b   :  { %v1029_v55 = vmul.f32 %v1408_v32, %v1989_v54  ;;  %v1410_v57 = vpop.eup %1409  ;;  %v1244_v54 = vld [vmem:[%s2119_s0 + $0xe8] sm:$0xff] }
 0x72d   :  { %v1031_v56 = vadd.f32 %v1030_v38, %v1029_v55 }
 0x72f   :  { %1411 = vtanh.f32 %v1031_v56 }
 0x739   :  { %v1412_v58 = vpop.eup %1411 }
 0x73a   :  { %v1033_v59 = vmul.f32 %v1412_v58, %v1410_v57 }
 0x73c   :  { %1242 = vst [vmem:[%s2120_s2 + $0x30] sm:$0xff] %v1033_v59  ;;  %v1041_v60 = vpack.c.bf16 %v1033_v59, %v1033_v59 }
 0x73e   :  { %1075 = vmatmul.mubr.bf16.vlgmr.msra.gmra.mrb[28].mxu0 %v1041_v60  ;;  %1116 = vmatmul.mubr.bf16.vlgmr.msra.gmra.mrb[28].mxu1 %v1041_v60 }
 0x811   :  { %v1076_v61 = vpop.f32.mrb[28].mxu0  ;;  %v1117_v6 = vpop.f32.mrb[28].mxu1 }
 0x812   :  { %v1124_v62 = vadd.f32 %v1243_v0, %v1076_v61  ;;  %v1078_v63 = vpop.f32.mrb[29].mxu0  ;;  %v1119_v34 = vpop.f32.mrb[29].mxu1  ;;  %v1126_v46 = vadd.f32 %v1245_v44, %v1117_v6 }
 0x813   :  { %v1125_v1 = vadd.f32 %v1244_v54, %v1078_v63  ;;  %v1080_v35 = vpop.f32.mrb[30].mxu0  ;;  %v1121_v36 = vpop.f32.mrb[30].mxu1  ;;  %v1127_v43 = vadd.f32 %v1246_v42, %v1119_v34 }
 0x814   :  { %v1247_v37 = vmul.f32 -1.442695, %v1124_v62  ;;  %v1081_v39 = vpop.f32.mrb[31].mxu0  ;;  %v1122_v40 = vpop.f32.mrb[31].mxu1 }
 0x815   :  { %v1248_v41 = vmul.f32 -1.442695, %v1125_v1  ;;  %v1249_v45 = vmul.f32 -1.442695, %v1127_v43 }
 0x816   :  { %1413 = vpow2.f32 %v1247_v37 }
 0x817   :  { %1415 = vpow2.f32 %v1248_v41 }
 0x818   :  { %1417 = vpow2.f32 %v1249_v45 }
 0x819   :  { %1419 = vtanh.f32 %v1126_v46 }
 0x820   :  { %v1414_v47 = vpop.eup %1413 }
 0x821   :  { %v1416_v48 = vpop.eup %1415  ;;  %v1131_v49 = vadd.f32 1.0, %v1414_v47 }
 0x822   :  { %v1137_v50 = vadd.f32 1.0, %v1416_v48  ;;  %v1418_v33 = vpop.eup %1417 }
 0x823   :  { %1421 = vrcp.f32 %v1131_v49  ;;  %v1420_v51 = vpop.eup %1419  ;;  %v1144_v4 = vadd.f32 1.0, %v1418_v33 }
 0x824   :  { %1423 = vrcp.f32 %v1137_v50 }
 0x825   :  { %1425 = vrcp.f32 %v1144_v4 }
 0x82d   :  { %v1422_v52 = vpop.eup %1421 }
 0x82e   :  { %v1424_v2 = vpop.eup %1423  ;;  %v1148_v3 = vmul.f32 %v1422_v52, %v1420_v51 }
 0x82f   :  { %v1147_v5 = vmul.f32 %v1424_v2, %v1031_v56  ;;  %v1426_v8 = vpop.eup %1425 }
 0x831   :  { %v1149_v7 = vadd.f32 %v1148_v3, %v1147_v5 }
 0x833   :  { %1427 = vtanh.f32 %v1149_v7 }
 0x83d   :  { %v1428_v9 = vpop.eup %1427 }
 0x83e   :  { %v1151_v10 = vmul.f32 %v1428_v9, %v1426_v8 }
 0x840   :  { %1250 = vst [vmem:[%s2120_s2 + $0x38] sm:$0xff] %v1151_v10 }

</bundles_post_ra>
